<compile_context>
chip_gen: v5e
topology: v5e:2x2
jax: 0.10.0
libtpu: 0.0.40
codegen_flags: <defaults>
</compile_context>

<pallas_src>
import functools

import jax
import jax.numpy as jnp
from jax.experimental import pallas as pl
from jax.experimental.pallas import tpu as pltpu

FILTER_SIZES = (1, 2, 3)


def textcnn_kernel(ids_ref, table_ref, wbig_ref, cbias_ref, fcw_ref, fcb_ref,
                   out_ref, embx_ref, *, block_b, L, E, F, filter_sizes,
                   compute_dtype):
    nk = len(filter_sizes)
    max_k = max(filter_sizes)
    V = table_ref.shape[0]
    BLt = block_b * L
    base = pl.program_id(0) * BLt

    # ---- embedding gather from SMEM ids; the dk-shifted copies ARE the conv taps.
    # embx[r, dk*E:(dk+1)*E] holds the embedding of token (r + dk), so the fused
    # matmul below directly produces every branch's conv output at time r.
    embx_ref[...] = jnp.zeros_like(embx_ref)   # tail rows of shifted groups -> 0
    for r in range(BLt):                       # static loop: only table row is dynamic
        tok = ids_ref[base + r]
        tok = jnp.minimum(jnp.maximum(tok, 0), V - 1)   # guard OOB ids (VMEM is unchecked)
        row = table_ref[pl.ds(tok, 1), :]               # (1, E) dynamic row load
        for dk in range(max_k):
            if r - dk >= 0:
                embx_ref[r - dk:r - dk + 1, dk * E:(dk + 1) * E] = row

    # ---- fused conv: one (BLt, max_k*E) x (max_k*E, nk*F) MXU matmul ----
    x = embx_ref[...].astype(compute_dtype)
    conv = jax.lax.dot_general(
        x, wbig_ref[...],
        dimension_numbers=(((1,), (1,)), ((), ())),      # contract last dims (no transpose)
        preferred_element_type=jnp.float32)              # (BLt, nk*F) f32 accumulation
    conv = jnp.maximum(conv + cbias_ref[...], 0.0)       # hoisted bias + ReLU
    conv = conv.reshape(block_b, L, nk * F)

    # ---- mask invalid time positions (t > L-k) to 0 AFTER ReLU, then max-pool ----
    t_iota = jax.lax.broadcasted_iota(jnp.int32, conv.shape, 1)
    lane = jax.lax.broadcasted_iota(jnp.int32, conv.shape, 2)
    limit = jnp.full(conv.shape, L - 1, jnp.int32)
    for i, k in enumerate(filter_sizes):
        limit = jnp.where((lane >= i * F) & (lane < (i + 1) * F), L - k, limit)
    conv = jnp.where(t_iota <= limit, conv, 0.0)          # exact: ReLU output >= 0
    pooled = jnp.max(conv, axis=1)                        # (block_b, nk*F)

    # ---- classifier (contract last dims; fc weight stored as (C, nk*F)) ----
    out = jax.lax.dot_general(
        pooled.astype(compute_dtype), fcw_ref[...],
        dimension_numbers=(((1,), (1,)), ((), ())),
        preferred_element_type=jnp.float32)               # (block_b, C)
    out_ref[...] = out + fcb_ref[...]


def textcnn_forward(idx, table, conv_ws, conv_bs, fc_w, fc_b, *,
                    compute_dtype=jnp.bfloat16, block_b=None):
    B, L = idx.shape
    V, E = table.shape
    filter_sizes = tuple(int(w.shape[0]) for w in conv_ws)
    nk = len(filter_sizes)
    max_k = max(filter_sizes)
    F = conv_ws[0].shape[1]
    C = fc_w.shape[0]
    assert fc_w.shape == (C, nk * F)

    # Batch tile: target >=128 matmul rows per block (MXU fill, esp. v5e) but keep
    # >=2 blocks when B allows so the "parallel" grid axis can feed both v7x TCs.
    if block_b is None:
        block_b = max(1, min(max(1, 128 // L), B // 2 if B >= 2 else 1, B))
        while B % block_b:
            block_b -= 1
    nb = B // block_b
    BLt = block_b * L

    ids = idx.reshape(B * L).astype(jnp.int32)

    # Stack all conv taps into one (nk*F, max_k*E) weight: block (i, dk) holds
    # branch i's tap-dk weights, zero where dk >= k_i.
    wbig = jnp.zeros((nk * F, max_k * E), jnp.float32)
    for i, (k, w) in enumerate(zip(filter_sizes, conv_ws)):   # w: (k, F, E)
        for dk in range(k):
            wbig = wbig.at[i * F:(i + 1) * F, dk * E:(dk + 1) * E].set(w[dk])
    cbias = jnp.concatenate(conv_bs).reshape(1, nk * F).astype(jnp.float32)
    fcb = fc_b.reshape(1, C).astype(jnp.float32)
    wbig = wbig.astype(compute_dtype)
    fcw = fc_w.astype(compute_dtype)

    const = lambda i, ids_ref: (0, 0)   # weights/table resident across the grid
    grid_spec = pltpu.PrefetchScalarGridSpec(
        num_scalar_prefetch=1,
        grid=(nb,),
        in_specs=[
            pl.BlockSpec((V, E), const),                 # embedding table
            pl.BlockSpec((nk * F, max_k * E), const),    # fused conv weight
            pl.BlockSpec((1, nk * F), const),            # fused conv bias
            pl.BlockSpec((C, nk * F), const),            # fc weight
            pl.BlockSpec((1, C), const),                 # fc bias
        ],
        out_specs=pl.BlockSpec((None, block_b, C), lambda i, ids_ref: (i, 0, 0)),
        scratch_shapes=[pltpu.VMEM((BLt, max_k * E), jnp.float32)],
    )

    flops = 2 * B * L * (max_k * E) * (nk * F) + 2 * B * (nk * F) * C
    bytes_accessed = (4 * B * L + 4 * V * E
                      + wbig.dtype.itemsize * int(wbig.size)
                      + fcw.dtype.itemsize * int(fcw.size)
                      + 4 * (nk * F + C) + 4 * B * C)
    cost = pl.CostEstimate(flops=int(flops), transcendentals=0,
                           bytes_accessed=int(bytes_accessed))

    out = pl.pallas_call(
        functools.partial(textcnn_kernel, block_b=block_b, L=L, E=E, F=F,
                          filter_sizes=filter_sizes, compute_dtype=compute_dtype),
        out_shape=jax.ShapeDtypeStruct((nb, block_b, C), jnp.float32),
        grid_spec=grid_spec,
        cost_estimate=cost,
        compiler_params=pltpu.CompilerParams(
            dimension_semantics=("parallel",)),
    )(ids, table.astype(jnp.float32), wbig, cbias, fcw, fcb)
    return out.reshape(B, C)


def _reference(idx, table, conv_ws, conv_bs, fc_w, fc_b):
    """Pure-JAX TextCNN forward (independent path: real gather + real conv)."""
    emb = table[idx]                                     # (B, L, E)
    x = emb[:, None, :, :]                               # (B, 1, L, E)
    feats = []
    for W, b in zip(conv_ws, conv_bs):                   # W: (k, F, E)
        w4 = jnp.transpose(W, (1, 0, 2))[:, None, :, :]  # (F, 1, k, E) == OIHW
        y = jax.lax.conv_general_dilated(
            x, w4, window_strides=(1, 1), padding="VALID",
            dimension_numbers=("NCHW", "OIHW", "NCHW"),
            precision=jax.lax.Precision.HIGHEST)         # (B, F, L-k+1, 1)
        y = jnp.maximum(y + b[None, :, None, None], 0.0)
        feats.append(jnp.max(y[..., 0], axis=2))         # (B, F)
    h = jnp.concatenate(feats, axis=1)                   # (B, nk*F)
    return jnp.dot(h, fc_w.T, precision=jax.lax.Precision.HIGHEST) + fc_b[None, :]


if __name__ == "__main__":
    key = jax.random.PRNGKey(0)
    # Small TPU-friendly shapes consistent with the module
    # (module defaults: n_vocab=20000, embed=1024, num_filters=100, num_classes=512).
    B, L = 4, 16
    V, E = 256, 128
    F_, C = 128, 128

    keys = jax.random.split(key, 10)
    idx = jax.random.randint(keys[0], (B, L), 0, V)
    table = jax.random.normal(keys[1], (V, E), dtype=jnp.float32)
    table = table.at[0].set(0.0)   # nn.Embedding(padding_idx=0): zero padding row

    conv_ws, conv_bs = [], []
    for i, k in enumerate(FILTER_SIZES):
        fan_in = k * E
        conv_ws.append(jax.random.normal(keys[2 + i], (k, F_, E), jnp.float32)
                       / jnp.sqrt(fan_in))
        conv_bs.append(jax.random.normal(keys[5 + i], (F_,), jnp.float32) * 0.1)
    fc_w = jax.random.normal(keys[8], (C, F_ * len(FILTER_SIZES)), jnp.float32) \
        / jnp.sqrt(F_ * len(FILTER_SIZES))
    fc_b = jax.random.normal(keys[9], (C,), jnp.float32) * 0.1

    # bf16 matmul inputs (native MXU path on v6e/v7x), f32 accumulation.
    out_bf16 = textcnn_forward(idx, table, conv_ws, conv_bs, fc_w, fc_b,
                               compute_dtype=jnp.bfloat16)
    # f32 path: tight numerical check of the kernel structure.
    out_f32 = textcnn_forward(idx, table, conv_ws, conv_bs, fc_w, fc_b,
                              compute_dtype=jnp.float32)
    out_bf16, out_f32 = jax.block_until_ready((out_bf16, out_f32))

    ref = _reference(idx, table, conv_ws, conv_bs, fc_w, fc_b)
    assert out_bf16.shape == (B, C) and out_f32.shape == (B, C)
    err32 = float(jnp.max(jnp.abs(out_f32 - ref)))
    err16 = float(jnp.max(jnp.abs(out_bf16 - ref)))
    # f32 path must match tightly; bf16 path trades ~1e-2 abs error for the
    # native-MXU throughput (inputs bf16, accumulation f32).
    assert jnp.allclose(out_f32, ref, rtol=3e-3, atol=3e-3), ("f32 max_abs_err", err32)
    assert jnp.allclose(out_bf16, ref, rtol=3e-2, atol=3e-2), ("bf16 max_abs_err", err16)
    print("KERNEL_OK")
</pallas_src>

<mosaic_0001>
module attributes {stable_mosaic.version = 11 : i64} {
  func.func @textcnn_kernel(%arg0: i32, %arg1: memref<64xi32, #tpu.memory_space<smem>>, %arg2: memref<256x128xf32, #tpu.memory_space<vmem>>, %arg3: memref<384x384xbf16, #tpu.memory_space<vmem>>, %arg4: memref<1x384xf32, #tpu.memory_space<vmem>>, %arg5: memref<128x384xbf16, #tpu.memory_space<vmem>>, %arg6: memref<1x128xf32, #tpu.memory_space<vmem>>, %arg7: memref<1x2x128xf32, #tpu.memory_space<vmem>>, %arg8: memref<32x384xf32, #tpu.memory_space<vmem>>) attributes {dimension_semantics = [#tpu.dimension_semantics<parallel>], iteration_bounds = array<i64: 2>, scalar_prefetch = 1 : i64, scratch_operands = 1 : i64, tpu.core_type = #tpu.core_type<tc>, window_params = [{pipeline_mode = #tpu.pipeline_mode<synchronous>, transform_indices = @transform_0, window_bounds = array<i64: 256, 128>}, {pipeline_mode = #tpu.pipeline_mode<synchronous>, transform_indices = @transform_1, window_bounds = array<i64: 384, 384>}, {pipeline_mode = #tpu.pipeline_mode<synchronous>, transform_indices = @transform_2, window_bounds = array<i64: 1, 384>}, {pipeline_mode = #tpu.pipeline_mode<synchronous>, transform_indices = @transform_3, window_bounds = array<i64: 128, 384>}, {pipeline_mode = #tpu.pipeline_mode<synchronous>, transform_indices = @transform_4, window_bounds = array<i64: 1, 128>}, {transform_indices = @transform_5, window_bounds = array<i64: 1, 2, 128>}]} {
    %c32_i32 = arith.constant 32 : i32
    %0 = arith.muli %arg0, %c32_i32 : i32
    %cst = arith.constant 0.000000e+00 : f32
    %1 = vector.broadcast %cst : f32 to vector<32x384xf32>
    %c0 = arith.constant 0 : index
    %c0_0 = arith.constant 0 : index
    %2 = vector.load %arg8[%c0, %c0_0] : memref<32x384xf32, #tpu.memory_space<vmem>>, vector<32x384xf32>
    tpu.vector_store %arg8[%c0, %c0_0], %1 {strides = array<i32>} : memref<32x384xf32, #tpu.memory_space<vmem>>, vector<32x384xf32>,
    %c0_i32 = arith.constant 0 : i32
    %3 = arith.addi %0, %c0_i32 : i32
    %4 = arith.index_cast %3 : i32 to index
    %5 = memref.load %arg1[%4] : memref<64xi32, #tpu.memory_space<smem>>
    %c0_i32_1 = arith.constant 0 : i32
    %6 = arith.maxsi %5, %c0_i32_1 : i32
    %c255_i32 = arith.constant 255 : i32
    %7 = arith.minsi %6, %c255_i32 : i32
    %8 = arith.index_cast %7 : i32 to index
    %c0_2 = arith.constant 0 : index
    %9 = vector.load %arg2[%8, %c0_2] : memref<256x128xf32, #tpu.memory_space<vmem>>, vector<1x128xf32>
    %c0_3 = arith.constant 0 : index
    %c0_4 = arith.constant 0 : index
    %10 = vector.load %arg8[%c0_3, %c0_4] : memref<32x384xf32, #tpu.memory_space<vmem>>, vector<1x128xf32>
    tpu.vector_store %arg8[%c0_3, %c0_4], %9 {strides = array<i32>} : memref<32x384xf32, #tpu.memory_space<vmem>>, vector<1x128xf32>,
    %c1_i32 = arith.constant 1 : i32
    %11 = arith.addi %0, %c1_i32 : i32
    %12 = arith.index_cast %11 : i32 to index
    %13 = memref.load %arg1[%12] : memref<64xi32, #tpu.memory_space<smem>>
    %c0_i32_5 = arith.constant 0 : i32
    %14 = arith.maxsi %13, %c0_i32_5 : i32
    %c255_i32_6 = arith.constant 255 : i32
    %15 = arith.minsi %14, %c255_i32_6 : i32
    %16 = arith.index_cast %15 : i32 to index
    %c0_7 = arith.constant 0 : index
    %17 = vector.load %arg2[%16, %c0_7] : memref<256x128xf32, #tpu.memory_space<vmem>>, vector<1x128xf32>
    %c1 = arith.constant 1 : index
    %c0_8 = arith.constant 0 : index
    %18 = vector.load %arg8[%c1, %c0_8] : memref<32x384xf32, #tpu.memory_space<vmem>>, vector<1x128xf32>
    tpu.vector_store %arg8[%c1, %c0_8], %17 {strides = array<i32>} : memref<32x384xf32, #tpu.memory_space<vmem>>, vector<1x128xf32>,
    %c0_9 = arith.constant 0 : index
    %c128 = arith.constant 128 : index
    %19 = vector.load %arg8[%c0_9, %c128] : memref<32x384xf32, #tpu.memory_space<vmem>>, vector<1x128xf32>
    tpu.vector_store %arg8[%c0_9, %c128], %17 {strides = array<i32>} : memref<32x384xf32, #tpu.memory_space<vmem>>, vector<1x128xf32>,
    %c2_i32 = arith.constant 2 : i32
    %20 = arith.addi %0, %c2_i32 : i32
    %21 = arith.index_cast %20 : i32 to index
    %22 = memref.load %arg1[%21] : memref<64xi32, #tpu.memory_space<smem>>
    %c0_i32_10 = arith.constant 0 : i32
    %23 = arith.maxsi %22, %c0_i32_10 : i32
    %c255_i32_11 = arith.constant 255 : i32
    %24 = arith.minsi %23, %c255_i32_11 : i32
    %25 = arith.index_cast %24 : i32 to index
    %c0_12 = arith.constant 0 : index
    %26 = vector.load %arg2[%25, %c0_12] : memref<256x128xf32, #tpu.memory_space<vmem>>, vector<1x128xf32>
    %c2 = arith.constant 2 : index
    %c0_13 = arith.constant 0 : index
    %27 = vector.load %arg8[%c2, %c0_13] : memref<32x384xf32, #tpu.memory_space<vmem>>, vector<1x128xf32>
    tpu.vector_store %arg8[%c2, %c0_13], %26 {strides = array<i32>} : memref<32x384xf32, #tpu.memory_space<vmem>>, vector<1x128xf32>,
    %c1_14 = arith.constant 1 : index
    %c128_15 = arith.constant 128 : index
    %28 = vector.load %arg8[%c1_14, %c128_15] : memref<32x384xf32, #tpu.memory_space<vmem>>, vector<1x128xf32>
    tpu.vector_store %arg8[%c1_14, %c128_15], %26 {strides = array<i32>} : memref<32x384xf32, #tpu.memory_space<vmem>>, vector<1x128xf32>,
    %c0_16 = arith.constant 0 : index
    %c256 = arith.constant 256 : index
    %29 = vector.load %arg8[%c0_16, %c256] : memref<32x384xf32, #tpu.memory_space<vmem>>, vector<1x128xf32>
    tpu.vector_store %arg8[%c0_16, %c256], %26 {strides = array<i32>} : memref<32x384xf32, #tpu.memory_space<vmem>>, vector<1x128xf32>,
    %c3_i32 = arith.constant 3 : i32
    %30 = arith.addi %0, %c3_i32 : i32
    %31 = arith.index_cast %30 : i32 to index
    %32 = memref.load %arg1[%31] : memref<64xi32, #tpu.memory_space<smem>>
    %c0_i32_17 = arith.constant 0 : i32
    %33 = arith.maxsi %32, %c0_i32_17 : i32
    %c255_i32_18 = arith.constant 255 : i32
    %34 = arith.minsi %33, %c255_i32_18 : i32
    %35 = arith.index_cast %34 : i32 to index
    %c0_19 = arith.constant 0 : index
    %36 = vector.load %arg2[%35, %c0_19] : memref<256x128xf32, #tpu.memory_space<vmem>>, vector<1x128xf32>
    %c3 = arith.constant 3 : index
    %c0_20 = arith.constant 0 : index
    %37 = vector.load %arg8[%c3, %c0_20] : memref<32x384xf32, #tpu.memory_space<vmem>>, vector<1x128xf32>
    tpu.vector_store %arg8[%c3, %c0_20], %36 {strides = array<i32>} : memref<32x384xf32, #tpu.memory_space<vmem>>, vector<1x128xf32>,
    %c2_21 = arith.constant 2 : index
    %c128_22 = arith.constant 128 : index
    %38 = vector.load %arg8[%c2_21, %c128_22] : memref<32x384xf32, #tpu.memory_space<vmem>>, vector<1x128xf32>
    tpu.vector_store %arg8[%c2_21, %c128_22], %36 {strides = array<i32>} : memref<32x384xf32, #tpu.memory_space<vmem>>, vector<1x128xf32>,
    %c1_23 = arith.constant 1 : index
    %c256_24 = arith.constant 256 : index
    %39 = vector.load %arg8[%c1_23, %c256_24] : memref<32x384xf32, #tpu.memory_space<vmem>>, vector<1x128xf32>
    tpu.vector_store %arg8[%c1_23, %c256_24], %36 {strides = array<i32>} : memref<32x384xf32, #tpu.memory_space<vmem>>, vector<1x128xf32>,
    %c4_i32 = arith.constant 4 : i32
    %40 = arith.addi %0, %c4_i32 : i32
    %41 = arith.index_cast %40 : i32 to index
    %42 = memref.load %arg1[%41] : memref<64xi32, #tpu.memory_space<smem>>
    %c0_i32_25 = arith.constant 0 : i32
    %43 = arith.maxsi %42, %c0_i32_25 : i32
    %c255_i32_26 = arith.constant 255 : i32
    %44 = arith.minsi %43, %c255_i32_26 : i32
    %45 = arith.index_cast %44 : i32 to index
    %c0_27 = arith.constant 0 : index
    %46 = vector.load %arg2[%45, %c0_27] : memref<256x128xf32, #tpu.memory_space<vmem>>, vector<1x128xf32>
    %c4 = arith.constant 4 : index
    %c0_28 = arith.constant 0 : index
    %47 = vector.load %arg8[%c4, %c0_28] : memref<32x384xf32, #tpu.memory_space<vmem>>, vector<1x128xf32>
    tpu.vector_store %arg8[%c4, %c0_28], %46 {strides = array<i32>} : memref<32x384xf32, #tpu.memory_space<vmem>>, vector<1x128xf32>,
    %c3_29 = arith.constant 3 : index
    %c128_30 = arith.constant 128 : index
    %48 = vector.load %arg8[%c3_29, %c128_30] : memref<32x384xf32, #tpu.memory_space<vmem>>, vector<1x128xf32>
    tpu.vector_store %arg8[%c3_29, %c128_30], %46 {strides = array<i32>} : memref<32x384xf32, #tpu.memory_space<vmem>>, vector<1x128xf32>,
    %c2_31 = arith.constant 2 : index
    %c256_32 = arith.constant 256 : index
    %49 = vector.load %arg8[%c2_31, %c256_32] : memref<32x384xf32, #tpu.memory_space<vmem>>, vector<1x128xf32>
    tpu.vector_store %arg8[%c2_31, %c256_32], %46 {strides = array<i32>} : memref<32x384xf32, #tpu.memory_space<vmem>>, vector<1x128xf32>,
    %c5_i32 = arith.constant 5 : i32
    %50 = arith.addi %0, %c5_i32 : i32
    %51 = arith.index_cast %50 : i32 to index
    %52 = memref.load %arg1[%51] : memref<64xi32, #tpu.memory_space<smem>>
    %c0_i32_33 = arith.constant 0 : i32
    %53 = arith.maxsi %52, %c0_i32_33 : i32
    %c255_i32_34 = arith.constant 255 : i32
    %54 = arith.minsi %53, %c255_i32_34 : i32
    %55 = arith.index_cast %54 : i32 to index
    %c0_35 = arith.constant 0 : index
    %56 = vector.load %arg2[%55, %c0_35] : memref<256x128xf32, #tpu.memory_space<vmem>>, vector<1x128xf32>
    %c5 = arith.constant 5 : index
    %c0_36 = arith.constant 0 : index
    %57 = vector.load %arg8[%c5, %c0_36] : memref<32x384xf32, #tpu.memory_space<vmem>>, vector<1x128xf32>
    tpu.vector_store %arg8[%c5, %c0_36], %56 {strides = array<i32>} : memref<32x384xf32, #tpu.memory_space<vmem>>, vector<1x128xf32>,
    %c4_37 = arith.constant 4 : index
    %c128_38 = arith.constant 128 : index
    %58 = vector.load %arg8[%c4_37, %c128_38] : memref<32x384xf32, #tpu.memory_space<vmem>>, vector<1x128xf32>
    tpu.vector_store %arg8[%c4_37, %c128_38], %56 {strides = array<i32>} : memref<32x384xf32, #tpu.memory_space<vmem>>, vector<1x128xf32>,
    %c3_39 = arith.constant 3 : index
    %c256_40 = arith.constant 256 : index
    %59 = vector.load %arg8[%c3_39, %c256_40] : memref<32x384xf32, #tpu.memory_space<vmem>>, vector<1x128xf32>
    tpu.vector_store %arg8[%c3_39, %c256_40], %56 {strides = array<i32>} : memref<32x384xf32, #tpu.memory_space<vmem>>, vector<1x128xf32>,
    %c6_i32 = arith.constant 6 : i32
    %60 = arith.addi %0, %c6_i32 : i32
    %61 = arith.index_cast %60 : i32 to index
    %62 = memref.load %arg1[%61] : memref<64xi32, #tpu.memory_space<smem>>
    %c0_i32_41 = arith.constant 0 : i32
    %63 = arith.maxsi %62, %c0_i32_41 : i32
    %c255_i32_42 = arith.constant 255 : i32
    %64 = arith.minsi %63, %c255_i32_42 : i32
    %65 = arith.index_cast %64 : i32 to index
    %c0_43 = arith.constant 0 : index
    %66 = vector.load %arg2[%65, %c0_43] : memref<256x128xf32, #tpu.memory_space<vmem>>, vector<1x128xf32>
    %c6 = arith.constant 6 : index
    %c0_44 = arith.constant 0 : index
    %67 = vector.load %arg8[%c6, %c0_44] : memref<32x384xf32, #tpu.memory_space<vmem>>, vector<1x128xf32>
    tpu.vector_store %arg8[%c6, %c0_44], %66 {strides = array<i32>} : memref<32x384xf32, #tpu.memory_space<vmem>>, vector<1x128xf32>,
    %c5_45 = arith.constant 5 : index
    %c128_46 = arith.constant 128 : index
    %68 = vector.load %arg8[%c5_45, %c128_46] : memref<32x384xf32, #tpu.memory_space<vmem>>, vector<1x128xf32>
    tpu.vector_store %arg8[%c5_45, %c128_46], %66 {strides = array<i32>} : memref<32x384xf32, #tpu.memory_space<vmem>>, vector<1x128xf32>,
    %c4_47 = arith.constant 4 : index
    %c256_48 = arith.constant 256 : index
    %69 = vector.load %arg8[%c4_47, %c256_48] : memref<32x384xf32, #tpu.memory_space<vmem>>, vector<1x128xf32>
    tpu.vector_store %arg8[%c4_47, %c256_48], %66 {strides = array<i32>} : memref<32x384xf32, #tpu.memory_space<vmem>>, vector<1x128xf32>,
    %c7_i32 = arith.constant 7 : i32
    %70 = arith.addi %0, %c7_i32 : i32
    %71 = arith.index_cast %70 : i32 to index
    %72 = memref.load %arg1[%71] : memref<64xi32, #tpu.memory_space<smem>>
    %c0_i32_49 = arith.constant 0 : i32
    %73 = arith.maxsi %72, %c0_i32_49 : i32
    %c255_i32_50 = arith.constant 255 : i32
    %74 = arith.minsi %73, %c255_i32_50 : i32
    %75 = arith.index_cast %74 : i32 to index
    %c0_51 = arith.constant 0 : index
    %76 = vector.load %arg2[%75, %c0_51] : memref<256x128xf32, #tpu.memory_space<vmem>>, vector<1x128xf32>
    %c7 = arith.constant 7 : index
    %c0_52 = arith.constant 0 : index
    %77 = vector.load %arg8[%c7, %c0_52] : memref<32x384xf32, #tpu.memory_space<vmem>>, vector<1x128xf32>
    tpu.vector_store %arg8[%c7, %c0_52], %76 {strides = array<i32>} : memref<32x384xf32, #tpu.memory_space<vmem>>, vector<1x128xf32>,
    %c6_53 = arith.constant 6 : index
    %c128_54 = arith.constant 128 : index
    %78 = vector.load %arg8[%c6_53, %c128_54] : memref<32x384xf32, #tpu.memory_space<vmem>>, vector<1x128xf32>
    tpu.vector_store %arg8[%c6_53, %c128_54], %76 {strides = array<i32>} : memref<32x384xf32, #tpu.memory_space<vmem>>, vector<1x128xf32>,
    %c5_55 = arith.constant 5 : index
    %c256_56 = arith.constant 256 : index
    %79 = vector.load %arg8[%c5_55, %c256_56] : memref<32x384xf32, #tpu.memory_space<vmem>>, vector<1x128xf32>
    tpu.vector_store %arg8[%c5_55, %c256_56], %76 {strides = array<i32>} : memref<32x384xf32, #tpu.memory_space<vmem>>, vector<1x128xf32>,
    %c8_i32 = arith.constant 8 : i32
    %80 = arith.addi %0, %c8_i32 : i32
    %81 = arith.index_cast %80 : i32 to index
    %82 = memref.load %arg1[%81] : memref<64xi32, #tpu.memory_space<smem>>
    %c0_i32_57 = arith.constant 0 : i32
    %83 = arith.maxsi %82, %c0_i32_57 : i32
    %c255_i32_58 = arith.constant 255 : i32
    %84 = arith.minsi %83, %c255_i32_58 : i32
    %85 = arith.index_cast %84 : i32 to index
    %c0_59 = arith.constant 0 : index
    %86 = vector.load %arg2[%85, %c0_59] : memref<256x128xf32, #tpu.memory_space<vmem>>, vector<1x128xf32>
    %c8 = arith.constant 8 : index
    %c0_60 = arith.constant 0 : index
    %87 = vector.load %arg8[%c8, %c0_60] : memref<32x384xf32, #tpu.memory_space<vmem>>, vector<1x128xf32>
    tpu.vector_store %arg8[%c8, %c0_60], %86 {strides = array<i32>} : memref<32x384xf32, #tpu.memory_space<vmem>>, vector<1x128xf32>,
    %c7_61 = arith.constant 7 : index
    %c128_62 = arith.constant 128 : index
    %88 = vector.load %arg8[%c7_61, %c128_62] : memref<32x384xf32, #tpu.memory_space<vmem>>, vector<1x128xf32>
    tpu.vector_store %arg8[%c7_61, %c128_62], %86 {strides = array<i32>} : memref<32x384xf32, #tpu.memory_space<vmem>>, vector<1x128xf32>,
    %c6_63 = arith.constant 6 : index
    %c256_64 = arith.constant 256 : index
    %89 = vector.load %arg8[%c6_63, %c256_64] : memref<32x384xf32, #tpu.memory_space<vmem>>, vector<1x128xf32>
    tpu.vector_store %arg8[%c6_63, %c256_64], %86 {strides = array<i32>} : memref<32x384xf32, #tpu.memory_space<vmem>>, vector<1x128xf32>,
    %c9_i32 = arith.constant 9 : i32
    %90 = arith.addi %0, %c9_i32 : i32
    %91 = arith.index_cast %90 : i32 to index
    %92 = memref.load %arg1[%91] : memref<64xi32, #tpu.memory_space<smem>>
    %c0_i32_65 = arith.constant 0 : i32
    %93 = arith.maxsi %92, %c0_i32_65 : i32
    %c255_i32_66 = arith.constant 255 : i32
    %94 = arith.minsi %93, %c255_i32_66 : i32
    %95 = arith.index_cast %94 : i32 to index
    %c0_67 = arith.constant 0 : index
    %96 = vector.load %arg2[%95, %c0_67] : memref<256x128xf32, #tpu.memory_space<vmem>>, vector<1x128xf32>
    %c9 = arith.constant 9 : index
    %c0_68 = arith.constant 0 : index
    %97 = vector.load %arg8[%c9, %c0_68] : memref<32x384xf32, #tpu.memory_space<vmem>>, vector<1x128xf32>
    tpu.vector_store %arg8[%c9, %c0_68], %96 {strides = array<i32>} : memref<32x384xf32, #tpu.memory_space<vmem>>, vector<1x128xf32>,
    %c8_69 = arith.constant 8 : index
    %c128_70 = arith.constant 128 : index
    %98 = vector.load %arg8[%c8_69, %c128_70] : memref<32x384xf32, #tpu.memory_space<vmem>>, vector<1x128xf32>
    tpu.vector_store %arg8[%c8_69, %c128_70], %96 {strides = array<i32>} : memref<32x384xf32, #tpu.memory_space<vmem>>, vector<1x128xf32>,
    %c7_71 = arith.constant 7 : index
    %c256_72 = arith.constant 256 : index
    %99 = vector.load %arg8[%c7_71, %c256_72] : memref<32x384xf32, #tpu.memory_space<vmem>>, vector<1x128xf32>
    tpu.vector_store %arg8[%c7_71, %c256_72], %96 {strides = array<i32>} : memref<32x384xf32, #tpu.memory_space<vmem>>, vector<1x128xf32>,
    %c10_i32 = arith.constant 10 : i32
    %100 = arith.addi %0, %c10_i32 : i32
    %101 = arith.index_cast %100 : i32 to index
    %102 = memref.load %arg1[%101] : memref<64xi32, #tpu.memory_space<smem>>
    %c0_i32_73 = arith.constant 0 : i32
    %103 = arith.maxsi %102, %c0_i32_73 : i32
    %c255_i32_74 = arith.constant 255 : i32
    %104 = arith.minsi %103, %c255_i32_74 : i32
    %105 = arith.index_cast %104 : i32 to index
    %c0_75 = arith.constant 0 : index
    %106 = vector.load %arg2[%105, %c0_75] : memref<256x128xf32, #tpu.memory_space<vmem>>, vector<1x128xf32>
    %c10 = arith.constant 10 : index
    %c0_76 = arith.constant 0 : index
    %107 = vector.load %arg8[%c10, %c0_76] : memref<32x384xf32, #tpu.memory_space<vmem>>, vector<1x128xf32>
    tpu.vector_store %arg8[%c10, %c0_76], %106 {strides = array<i32>} : memref<32x384xf32, #tpu.memory_space<vmem>>, vector<1x128xf32>,
    %c9_77 = arith.constant 9 : index
    %c128_78 = arith.constant 128 : index
    %108 = vector.load %arg8[%c9_77, %c128_78] : memref<32x384xf32, #tpu.memory_space<vmem>>, vector<1x128xf32>
    tpu.vector_store %arg8[%c9_77, %c128_78], %106 {strides = array<i32>} : memref<32x384xf32, #tpu.memory_space<vmem>>, vector<1x128xf32>,
    %c8_79 = arith.constant 8 : index
    %c256_80 = arith.constant 256 : index
    %109 = vector.load %arg8[%c8_79, %c256_80] : memref<32x384xf32, #tpu.memory_space<vmem>>, vector<1x128xf32>
    tpu.vector_store %arg8[%c8_79, %c256_80], %106 {strides = array<i32>} : memref<32x384xf32, #tpu.memory_space<vmem>>, vector<1x128xf32>,
    %c11_i32 = arith.constant 11 : i32
    %110 = arith.addi %0, %c11_i32 : i32
    %111 = arith.index_cast %110 : i32 to index
    %112 = memref.load %arg1[%111] : memref<64xi32, #tpu.memory_space<smem>>
    %c0_i32_81 = arith.constant 0 : i32
    %113 = arith.maxsi %112, %c0_i32_81 : i32
    %c255_i32_82 = arith.constant 255 : i32
    %114 = arith.minsi %113, %c255_i32_82 : i32
    %115 = arith.index_cast %114 : i32 to index
    %c0_83 = arith.constant 0 : index
    %116 = vector.load %arg2[%115, %c0_83] : memref<256x128xf32, #tpu.memory_space<vmem>>, vector<1x128xf32>
    %c11 = arith.constant 11 : index
    %c0_84 = arith.constant 0 : index
    %117 = vector.load %arg8[%c11, %c0_84] : memref<32x384xf32, #tpu.memory_space<vmem>>, vector<1x128xf32>
    tpu.vector_store %arg8[%c11, %c0_84], %116 {strides = array<i32>} : memref<32x384xf32, #tpu.memory_space<vmem>>, vector<1x128xf32>,
    %c10_85 = arith.constant 10 : index
    %c128_86 = arith.constant 128 : index
    %118 = vector.load %arg8[%c10_85, %c128_86] : memref<32x384xf32, #tpu.memory_space<vmem>>, vector<1x128xf32>
    tpu.vector_store %arg8[%c10_85, %c128_86], %116 {strides = array<i32>} : memref<32x384xf32, #tpu.memory_space<vmem>>, vector<1x128xf32>,
    %c9_87 = arith.constant 9 : index
    %c256_88 = arith.constant 256 : index
    %119 = vector.load %arg8[%c9_87, %c256_88] : memref<32x384xf32, #tpu.memory_space<vmem>>, vector<1x128xf32>
    tpu.vector_store %arg8[%c9_87, %c256_88], %116 {strides = array<i32>} : memref<32x384xf32, #tpu.memory_space<vmem>>, vector<1x128xf32>,
    %c12_i32 = arith.constant 12 : i32
    %120 = arith.addi %0, %c12_i32 : i32
    %121 = arith.index_cast %120 : i32 to index
    %122 = memref.load %arg1[%121] : memref<64xi32, #tpu.memory_space<smem>>
    %c0_i32_89 = arith.constant 0 : i32
    %123 = arith.maxsi %122, %c0_i32_89 : i32
    %c255_i32_90 = arith.constant 255 : i32
    %124 = arith.minsi %123, %c255_i32_90 : i32
    %125 = arith.index_cast %124 : i32 to index
    %c0_91 = arith.constant 0 : index
    %126 = vector.load %arg2[%125, %c0_91] : memref<256x128xf32, #tpu.memory_space<vmem>>, vector<1x128xf32>
    %c12 = arith.constant 12 : index
    %c0_92 = arith.constant 0 : index
    %127 = vector.load %arg8[%c12, %c0_92] : memref<32x384xf32, #tpu.memory_space<vmem>>, vector<1x128xf32>
    tpu.vector_store %arg8[%c12, %c0_92], %126 {strides = array<i32>} : memref<32x384xf32, #tpu.memory_space<vmem>>, vector<1x128xf32>,
    %c11_93 = arith.constant 11 : index
    %c128_94 = arith.constant 128 : index
    %128 = vector.load %arg8[%c11_93, %c128_94] : memref<32x384xf32, #tpu.memory_space<vmem>>, vector<1x128xf32>
    tpu.vector_store %arg8[%c11_93, %c128_94], %126 {strides = array<i32>} : memref<32x384xf32, #tpu.memory_space<vmem>>, vector<1x128xf32>,
    %c10_95 = arith.constant 10 : index
    %c256_96 = arith.constant 256 : index
    %129 = vector.load %arg8[%c10_95, %c256_96] : memref<32x384xf32, #tpu.memory_space<vmem>>, vector<1x128xf32>
    tpu.vector_store %arg8[%c10_95, %c256_96], %126 {strides = array<i32>} : memref<32x384xf32, #tpu.memory_space<vmem>>, vector<1x128xf32>,
    %c13_i32 = arith.constant 13 : i32
    %130 = arith.addi %0, %c13_i32 : i32
    %131 = arith.index_cast %130 : i32 to index
    %132 = memref.load %arg1[%131] : memref<64xi32, #tpu.memory_space<smem>>
    %c0_i32_97 = arith.constant 0 : i32
    %133 = arith.maxsi %132, %c0_i32_97 : i32
    %c255_i32_98 = arith.constant 255 : i32
    %134 = arith.minsi %133, %c255_i32_98 : i32
    %135 = arith.index_cast %134 : i32 to index
    %c0_99 = arith.constant 0 : index
    %136 = vector.load %arg2[%135, %c0_99] : memref<256x128xf32, #tpu.memory_space<vmem>>, vector<1x128xf32>
    %c13 = arith.constant 13 : index
    %c0_100 = arith.constant 0 : index
    %137 = vector.load %arg8[%c13, %c0_100] : memref<32x384xf32, #tpu.memory_space<vmem>>, vector<1x128xf32>
    tpu.vector_store %arg8[%c13, %c0_100], %136 {strides = array<i32>} : memref<32x384xf32, #tpu.memory_space<vmem>>, vector<1x128xf32>,
    %c12_101 = arith.constant 12 : index
    %c128_102 = arith.constant 128 : index
    %138 = vector.load %arg8[%c12_101, %c128_102] : memref<32x384xf32, #tpu.memory_space<vmem>>, vector<1x128xf32>
    tpu.vector_store %arg8[%c12_101, %c128_102], %136 {strides = array<i32>} : memref<32x384xf32, #tpu.memory_space<vmem>>, vector<1x128xf32>,
    %c11_103 = arith.constant 11 : index
    %c256_104 = arith.constant 256 : index
    %139 = vector.load %arg8[%c11_103, %c256_104] : memref<32x384xf32, #tpu.memory_space<vmem>>, vector<1x128xf32>
    tpu.vector_store %arg8[%c11_103, %c256_104], %136 {strides = array<i32>} : memref<32x384xf32, #tpu.memory_space<vmem>>, vector<1x128xf32>,
    %c14_i32 = arith.constant 14 : i32
    %140 = arith.addi %0, %c14_i32 : i32
    %141 = arith.index_cast %140 : i32 to index
    %142 = memref.load %arg1[%141] : memref<64xi32, #tpu.memory_space<smem>>
    %c0_i32_105 = arith.constant 0 : i32
    %143 = arith.maxsi %142, %c0_i32_105 : i32
    %c255_i32_106 = arith.constant 255 : i32
    %144 = arith.minsi %143, %c255_i32_106 : i32
    %145 = arith.index_cast %144 : i32 to index
    %c0_107 = arith.constant 0 : index
    %146 = vector.load %arg2[%145, %c0_107] : memref<256x128xf32, #tpu.memory_space<vmem>>, vector<1x128xf32>
    %c14 = arith.constant 14 : index
    %c0_108 = arith.constant 0 : index
    %147 = vector.load %arg8[%c14, %c0_108] : memref<32x384xf32, #tpu.memory_space<vmem>>, vector<1x128xf32>
    tpu.vector_store %arg8[%c14, %c0_108], %146 {strides = array<i32>} : memref<32x384xf32, #tpu.memory_space<vmem>>, vector<1x128xf32>,
    %c13_109 = arith.constant 13 : index
    %c128_110 = arith.constant 128 : index
    %148 = vector.load %arg8[%c13_109, %c128_110] : memref<32x384xf32, #tpu.memory_space<vmem>>, vector<1x128xf32>
    tpu.vector_store %arg8[%c13_109, %c128_110], %146 {strides = array<i32>} : memref<32x384xf32, #tpu.memory_space<vmem>>, vector<1x128xf32>,
    %c12_111 = arith.constant 12 : index
    %c256_112 = arith.constant 256 : index
    %149 = vector.load %arg8[%c12_111, %c256_112] : memref<32x384xf32, #tpu.memory_space<vmem>>, vector<1x128xf32>
    tpu.vector_store %arg8[%c12_111, %c256_112], %146 {strides = array<i32>} : memref<32x384xf32, #tpu.memory_space<vmem>>, vector<1x128xf32>,
    %c15_i32 = arith.constant 15 : i32
    %150 = arith.addi %0, %c15_i32 : i32
    %151 = arith.index_cast %150 : i32 to index
    %152 = memref.load %arg1[%151] : memref<64xi32, #tpu.memory_space<smem>>
    %c0_i32_113 = arith.constant 0 : i32
    %153 = arith.maxsi %152, %c0_i32_113 : i32
    %c255_i32_114 = arith.constant 255 : i32
    %154 = arith.minsi %153, %c255_i32_114 : i32
    %155 = arith.index_cast %154 : i32 to index
    %c0_115 = arith.constant 0 : index
    %156 = vector.load %arg2[%155, %c0_115] : memref<256x128xf32, #tpu.memory_space<vmem>>, vector<1x128xf32>
    %c15 = arith.constant 15 : index
    %c0_116 = arith.constant 0 : index
    %157 = vector.load %arg8[%c15, %c0_116] : memref<32x384xf32, #tpu.memory_space<vmem>>, vector<1x128xf32>
    tpu.vector_store %arg8[%c15, %c0_116], %156 {strides = array<i32>} : memref<32x384xf32, #tpu.memory_space<vmem>>, vector<1x128xf32>,
    %c14_117 = arith.constant 14 : index
    %c128_118 = arith.constant 128 : index
    %158 = vector.load %arg8[%c14_117, %c128_118] : memref<32x384xf32, #tpu.memory_space<vmem>>, vector<1x128xf32>
    tpu.vector_store %arg8[%c14_117, %c128_118], %156 {strides = array<i32>} : memref<32x384xf32, #tpu.memory_space<vmem>>, vector<1x128xf32>,
    %c13_119 = arith.constant 13 : index
    %c256_120 = arith.constant 256 : index
    %159 = vector.load %arg8[%c13_119, %c256_120] : memref<32x384xf32, #tpu.memory_space<vmem>>, vector<1x128xf32>
    tpu.vector_store %arg8[%c13_119, %c256_120], %156 {strides = array<i32>} : memref<32x384xf32, #tpu.memory_space<vmem>>, vector<1x128xf32>,
    %c16_i32 = arith.constant 16 : i32
    %160 = arith.addi %0, %c16_i32 : i32
    %161 = arith.index_cast %160 : i32 to index
    %162 = memref.load %arg1[%161] : memref<64xi32, #tpu.memory_space<smem>>
    %c0_i32_121 = arith.constant 0 : i32
    %163 = arith.maxsi %162, %c0_i32_121 : i32
    %c255_i32_122 = arith.constant 255 : i32
    %164 = arith.minsi %163, %c255_i32_122 : i32
    %165 = arith.index_cast %164 : i32 to index
    %c0_123 = arith.constant 0 : index
    %166 = vector.load %arg2[%165, %c0_123] : memref<256x128xf32, #tpu.memory_space<vmem>>, vector<1x128xf32>
    %c16 = arith.constant 16 : index
    %c0_124 = arith.constant 0 : index
    %167 = vector.load %arg8[%c16, %c0_124] : memref<32x384xf32, #tpu.memory_space<vmem>>, vector<1x128xf32>
    tpu.vector_store %arg8[%c16, %c0_124], %166 {strides = array<i32>} : memref<32x384xf32, #tpu.memory_space<vmem>>, vector<1x128xf32>,
    %c15_125 = arith.constant 15 : index
    %c128_126 = arith.constant 128 : index
    %168 = vector.load %arg8[%c15_125, %c128_126] : memref<32x384xf32, #tpu.memory_space<vmem>>, vector<1x128xf32>
    tpu.vector_store %arg8[%c15_125, %c128_126], %166 {strides = array<i32>} : memref<32x384xf32, #tpu.memory_space<vmem>>, vector<1x128xf32>,
    %c14_127 = arith.constant 14 : index
    %c256_128 = arith.constant 256 : index
    %169 = vector.load %arg8[%c14_127, %c256_128] : memref<32x384xf32, #tpu.memory_space<vmem>>, vector<1x128xf32>
    tpu.vector_store %arg8[%c14_127, %c256_128], %166 {strides = array<i32>} : memref<32x384xf32, #tpu.memory_space<vmem>>, vector<1x128xf32>,
    %c17_i32 = arith.constant 17 : i32
    %170 = arith.addi %0, %c17_i32 : i32
    %171 = arith.index_cast %170 : i32 to index
    %172 = memref.load %arg1[%171] : memref<64xi32, #tpu.memory_space<smem>>
    %c0_i32_129 = arith.constant 0 : i32
    %173 = arith.maxsi %172, %c0_i32_129 : i32
    %c255_i32_130 = arith.constant 255 : i32
    %174 = arith.minsi %173, %c255_i32_130 : i32
    %175 = arith.index_cast %174 : i32 to index
    %c0_131 = arith.constant 0 : index
    %176 = vector.load %arg2[%175, %c0_131] : memref<256x128xf32, #tpu.memory_space<vmem>>, vector<1x128xf32>
    %c17 = arith.constant 17 : index
    %c0_132 = arith.constant 0 : index
    %177 = vector.load %arg8[%c17, %c0_132] : memref<32x384xf32, #tpu.memory_space<vmem>>, vector<1x128xf32>
    tpu.vector_store %arg8[%c17, %c0_132], %176 {strides = array<i32>} : memref<32x384xf32, #tpu.memory_space<vmem>>, vector<1x128xf32>,
    %c16_133 = arith.constant 16 : index
    %c128_134 = arith.constant 128 : index
    %178 = vector.load %arg8[%c16_133, %c128_134] : memref<32x384xf32, #tpu.memory_space<vmem>>, vector<1x128xf32>
    tpu.vector_store %arg8[%c16_133, %c128_134], %176 {strides = array<i32>} : memref<32x384xf32, #tpu.memory_space<vmem>>, vector<1x128xf32>,
    %c15_135 = arith.constant 15 : index
    %c256_136 = arith.constant 256 : index
    %179 = vector.load %arg8[%c15_135, %c256_136] : memref<32x384xf32, #tpu.memory_space<vmem>>, vector<1x128xf32>
    tpu.vector_store %arg8[%c15_135, %c256_136], %176 {strides = array<i32>} : memref<32x384xf32, #tpu.memory_space<vmem>>, vector<1x128xf32>,
    %c18_i32 = arith.constant 18 : i32
    %180 = arith.addi %0, %c18_i32 : i32
    %181 = arith.index_cast %180 : i32 to index
    %182 = memref.load %arg1[%181] : memref<64xi32, #tpu.memory_space<smem>>
    %c0_i32_137 = arith.constant 0 : i32
    %183 = arith.maxsi %182, %c0_i32_137 : i32
    %c255_i32_138 = arith.constant 255 : i32
    %184 = arith.minsi %183, %c255_i32_138 : i32
    %185 = arith.index_cast %184 : i32 to index
    %c0_139 = arith.constant 0 : index
    %186 = vector.load %arg2[%185, %c0_139] : memref<256x128xf32, #tpu.memory_space<vmem>>, vector<1x128xf32>
    %c18 = arith.constant 18 : index
    %c0_140 = arith.constant 0 : index
    %187 = vector.load %arg8[%c18, %c0_140] : memref<32x384xf32, #tpu.memory_space<vmem>>, vector<1x128xf32>
    tpu.vector_store %arg8[%c18, %c0_140], %186 {strides = array<i32>} : memref<32x384xf32, #tpu.memory_space<vmem>>, vector<1x128xf32>,
    %c17_141 = arith.constant 17 : index
    %c128_142 = arith.constant 128 : index
    %188 = vector.load %arg8[%c17_141, %c128_142] : memref<32x384xf32, #tpu.memory_space<vmem>>, vector<1x128xf32>
    tpu.vector_store %arg8[%c17_141, %c128_142], %186 {strides = array<i32>} : memref<32x384xf32, #tpu.memory_space<vmem>>, vector<1x128xf32>,
    %c16_143 = arith.constant 16 : index
    %c256_144 = arith.constant 256 : index
    %189 = vector.load %arg8[%c16_143, %c256_144] : memref<32x384xf32, #tpu.memory_space<vmem>>, vector<1x128xf32>
    tpu.vector_store %arg8[%c16_143, %c256_144], %186 {strides = array<i32>} : memref<32x384xf32, #tpu.memory_space<vmem>>, vector<1x128xf32>,
    %c19_i32 = arith.constant 19 : i32
    %190 = arith.addi %0, %c19_i32 : i32
    %191 = arith.index_cast %190 : i32 to index
    %192 = memref.load %arg1[%191] : memref<64xi32, #tpu.memory_space<smem>>
    %c0_i32_145 = arith.constant 0 : i32
    %193 = arith.maxsi %192, %c0_i32_145 : i32
    %c255_i32_146 = arith.constant 255 : i32
    %194 = arith.minsi %193, %c255_i32_146 : i32
    %195 = arith.index_cast %194 : i32 to index
    %c0_147 = arith.constant 0 : index
    %196 = vector.load %arg2[%195, %c0_147] : memref<256x128xf32, #tpu.memory_space<vmem>>, vector<1x128xf32>
    %c19 = arith.constant 19 : index
    %c0_148 = arith.constant 0 : index
    %197 = vector.load %arg8[%c19, %c0_148] : memref<32x384xf32, #tpu.memory_space<vmem>>, vector<1x128xf32>
    tpu.vector_store %arg8[%c19, %c0_148], %196 {strides = array<i32>} : memref<32x384xf32, #tpu.memory_space<vmem>>, vector<1x128xf32>,
    %c18_149 = arith.constant 18 : index
    %c128_150 = arith.constant 128 : index
    %198 = vector.load %arg8[%c18_149, %c128_150] : memref<32x384xf32, #tpu.memory_space<vmem>>, vector<1x128xf32>
    tpu.vector_store %arg8[%c18_149, %c128_150], %196 {strides = array<i32>} : memref<32x384xf32, #tpu.memory_space<vmem>>, vector<1x128xf32>,
    %c17_151 = arith.constant 17 : index
    %c256_152 = arith.constant 256 : index
    %199 = vector.load %arg8[%c17_151, %c256_152] : memref<32x384xf32, #tpu.memory_space<vmem>>, vector<1x128xf32>
    tpu.vector_store %arg8[%c17_151, %c256_152], %196 {strides = array<i32>} : memref<32x384xf32, #tpu.memory_space<vmem>>, vector<1x128xf32>,
    %c20_i32 = arith.constant 20 : i32
    %200 = arith.addi %0, %c20_i32 : i32
    %201 = arith.index_cast %200 : i32 to index
    %202 = memref.load %arg1[%201] : memref<64xi32, #tpu.memory_space<smem>>
    %c0_i32_153 = arith.constant 0 : i32
    %203 = arith.maxsi %202, %c0_i32_153 : i32
    %c255_i32_154 = arith.constant 255 : i32
    %204 = arith.minsi %203, %c255_i32_154 : i32
    %205 = arith.index_cast %204 : i32 to index
    %c0_155 = arith.constant 0 : index
    %206 = vector.load %arg2[%205, %c0_155] : memref<256x128xf32, #tpu.memory_space<vmem>>, vector<1x128xf32>
    %c20 = arith.constant 20 : index
    %c0_156 = arith.constant 0 : index
    %207 = vector.load %arg8[%c20, %c0_156] : memref<32x384xf32, #tpu.memory_space<vmem>>, vector<1x128xf32>
    tpu.vector_store %arg8[%c20, %c0_156], %206 {strides = array<i32>} : memref<32x384xf32, #tpu.memory_space<vmem>>, vector<1x128xf32>,
    %c19_157 = arith.constant 19 : index
    %c128_158 = arith.constant 128 : index
    %208 = vector.load %arg8[%c19_157, %c128_158] : memref<32x384xf32, #tpu.memory_space<vmem>>, vector<1x128xf32>
    tpu.vector_store %arg8[%c19_157, %c128_158], %206 {strides = array<i32>} : memref<32x384xf32, #tpu.memory_space<vmem>>, vector<1x128xf32>,
    %c18_159 = arith.constant 18 : index
    %c256_160 = arith.constant 256 : index
    %209 = vector.load %arg8[%c18_159, %c256_160] : memref<32x384xf32, #tpu.memory_space<vmem>>, vector<1x128xf32>
    tpu.vector_store %arg8[%c18_159, %c256_160], %206 {strides = array<i32>} : memref<32x384xf32, #tpu.memory_space<vmem>>, vector<1x128xf32>,
    %c21_i32 = arith.constant 21 : i32
    %210 = arith.addi %0, %c21_i32 : i32
    %211 = arith.index_cast %210 : i32 to index
    %212 = memref.load %arg1[%211] : memref<64xi32, #tpu.memory_space<smem>>
    %c0_i32_161 = arith.constant 0 : i32
    %213 = arith.maxsi %212, %c0_i32_161 : i32
    %c255_i32_162 = arith.constant 255 : i32
    %214 = arith.minsi %213, %c255_i32_162 : i32
    %215 = arith.index_cast %214 : i32 to index
    %c0_163 = arith.constant 0 : index
    %216 = vector.load %arg2[%215, %c0_163] : memref<256x128xf32, #tpu.memory_space<vmem>>, vector<1x128xf32>
    %c21 = arith.constant 21 : index
    %c0_164 = arith.constant 0 : index
    %217 = vector.load %arg8[%c21, %c0_164] : memref<32x384xf32, #tpu.memory_space<vmem>>, vector<1x128xf32>
    tpu.vector_store %arg8[%c21, %c0_164], %216 {strides = array<i32>} : memref<32x384xf32, #tpu.memory_space<vmem>>, vector<1x128xf32>,
    %c20_165 = arith.constant 20 : index
    %c128_166 = arith.constant 128 : index
    %218 = vector.load %arg8[%c20_165, %c128_166] : memref<32x384xf32, #tpu.memory_space<vmem>>, vector<1x128xf32>
    tpu.vector_store %arg8[%c20_165, %c128_166], %216 {strides = array<i32>} : memref<32x384xf32, #tpu.memory_space<vmem>>, vector<1x128xf32>,
    %c19_167 = arith.constant 19 : index
    %c256_168 = arith.constant 256 : index
    %219 = vector.load %arg8[%c19_167, %c256_168] : memref<32x384xf32, #tpu.memory_space<vmem>>, vector<1x128xf32>
    tpu.vector_store %arg8[%c19_167, %c256_168], %216 {strides = array<i32>} : memref<32x384xf32, #tpu.memory_space<vmem>>, vector<1x128xf32>,
    %c22_i32 = arith.constant 22 : i32
    %220 = arith.addi %0, %c22_i32 : i32
    %221 = arith.index_cast %220 : i32 to index
    %222 = memref.load %arg1[%221] : memref<64xi32, #tpu.memory_space<smem>>
    %c0_i32_169 = arith.constant 0 : i32
    %223 = arith.maxsi %222, %c0_i32_169 : i32
    %c255_i32_170 = arith.constant 255 : i32
    %224 = arith.minsi %223, %c255_i32_170 : i32
    %225 = arith.index_cast %224 : i32 to index
    %c0_171 = arith.constant 0 : index
    %226 = vector.load %arg2[%225, %c0_171] : memref<256x128xf32, #tpu.memory_space<vmem>>, vector<1x128xf32>
    %c22 = arith.constant 22 : index
    %c0_172 = arith.constant 0 : index
    %227 = vector.load %arg8[%c22, %c0_172] : memref<32x384xf32, #tpu.memory_space<vmem>>, vector<1x128xf32>
    tpu.vector_store %arg8[%c22, %c0_172], %226 {strides = array<i32>} : memref<32x384xf32, #tpu.memory_space<vmem>>, vector<1x128xf32>,
    %c21_173 = arith.constant 21 : index
    %c128_174 = arith.constant 128 : index
    %228 = vector.load %arg8[%c21_173, %c128_174] : memref<32x384xf32, #tpu.memory_space<vmem>>, vector<1x128xf32>
    tpu.vector_store %arg8[%c21_173, %c128_174], %226 {strides = array<i32>} : memref<32x384xf32, #tpu.memory_space<vmem>>, vector<1x128xf32>,
    %c20_175 = arith.constant 20 : index
    %c256_176 = arith.constant 256 : index
    %229 = vector.load %arg8[%c20_175, %c256_176] : memref<32x384xf32, #tpu.memory_space<vmem>>, vector<1x128xf32>
    tpu.vector_store %arg8[%c20_175, %c256_176], %226 {strides = array<i32>} : memref<32x384xf32, #tpu.memory_space<vmem>>, vector<1x128xf32>,
    %c23_i32 = arith.constant 23 : i32
    %230 = arith.addi %0, %c23_i32 : i32
    %231 = arith.index_cast %230 : i32 to index
    %232 = memref.load %arg1[%231] : memref<64xi32, #tpu.memory_space<smem>>
    %c0_i32_177 = arith.constant 0 : i32
    %233 = arith.maxsi %232, %c0_i32_177 : i32
    %c255_i32_178 = arith.constant 255 : i32
    %234 = arith.minsi %233, %c255_i32_178 : i32
    %235 = arith.index_cast %234 : i32 to index
    %c0_179 = arith.constant 0 : index
    %236 = vector.load %arg2[%235, %c0_179] : memref<256x128xf32, #tpu.memory_space<vmem>>, vector<1x128xf32>
    %c23 = arith.constant 23 : index
    %c0_180 = arith.constant 0 : index
    %237 = vector.load %arg8[%c23, %c0_180] : memref<32x384xf32, #tpu.memory_space<vmem>>, vector<1x128xf32>
    tpu.vector_store %arg8[%c23, %c0_180], %236 {strides = array<i32>} : memref<32x384xf32, #tpu.memory_space<vmem>>, vector<1x128xf32>,
    %c22_181 = arith.constant 22 : index
    %c128_182 = arith.constant 128 : index
    %238 = vector.load %arg8[%c22_181, %c128_182] : memref<32x384xf32, #tpu.memory_space<vmem>>, vector<1x128xf32>
    tpu.vector_store %arg8[%c22_181, %c128_182], %236 {strides = array<i32>} : memref<32x384xf32, #tpu.memory_space<vmem>>, vector<1x128xf32>,
    %c21_183 = arith.constant 21 : index
    %c256_184 = arith.constant 256 : index
    %239 = vector.load %arg8[%c21_183, %c256_184] : memref<32x384xf32, #tpu.memory_space<vmem>>, vector<1x128xf32>
    tpu.vector_store %arg8[%c21_183, %c256_184], %236 {strides = array<i32>} : memref<32x384xf32, #tpu.memory_space<vmem>>, vector<1x128xf32>,
    %c24_i32 = arith.constant 24 : i32
    %240 = arith.addi %0, %c24_i32 : i32
    %241 = arith.index_cast %240 : i32 to index
    %242 = memref.load %arg1[%241] : memref<64xi32, #tpu.memory_space<smem>>
    %c0_i32_185 = arith.constant 0 : i32
    %243 = arith.maxsi %242, %c0_i32_185 : i32
    %c255_i32_186 = arith.constant 255 : i32
    %244 = arith.minsi %243, %c255_i32_186 : i32
    %245 = arith.index_cast %244 : i32 to index
    %c0_187 = arith.constant 0 : index
    %246 = vector.load %arg2[%245, %c0_187] : memref<256x128xf32, #tpu.memory_space<vmem>>, vector<1x128xf32>
    %c24 = arith.constant 24 : index
    %c0_188 = arith.constant 0 : index
    %247 = vector.load %arg8[%c24, %c0_188] : memref<32x384xf32, #tpu.memory_space<vmem>>, vector<1x128xf32>
    tpu.vector_store %arg8[%c24, %c0_188], %246 {strides = array<i32>} : memref<32x384xf32, #tpu.memory_space<vmem>>, vector<1x128xf32>,
    %c23_189 = arith.constant 23 : index
    %c128_190 = arith.constant 128 : index
    %248 = vector.load %arg8[%c23_189, %c128_190] : memref<32x384xf32, #tpu.memory_space<vmem>>, vector<1x128xf32>
    tpu.vector_store %arg8[%c23_189, %c128_190], %246 {strides = array<i32>} : memref<32x384xf32, #tpu.memory_space<vmem>>, vector<1x128xf32>,
    %c22_191 = arith.constant 22 : index
    %c256_192 = arith.constant 256 : index
    %249 = vector.load %arg8[%c22_191, %c256_192] : memref<32x384xf32, #tpu.memory_space<vmem>>, vector<1x128xf32>
    tpu.vector_store %arg8[%c22_191, %c256_192], %246 {strides = array<i32>} : memref<32x384xf32, #tpu.memory_space<vmem>>, vector<1x128xf32>,
    %c25_i32 = arith.constant 25 : i32
    %250 = arith.addi %0, %c25_i32 : i32
    %251 = arith.index_cast %250 : i32 to index
    %252 = memref.load %arg1[%251] : memref<64xi32, #tpu.memory_space<smem>>
    %c0_i32_193 = arith.constant 0 : i32
    %253 = arith.maxsi %252, %c0_i32_193 : i32
    %c255_i32_194 = arith.constant 255 : i32
    %254 = arith.minsi %253, %c255_i32_194 : i32
    %255 = arith.index_cast %254 : i32 to index
    %c0_195 = arith.constant 0 : index
    %256 = vector.load %arg2[%255, %c0_195] : memref<256x128xf32, #tpu.memory_space<vmem>>, vector<1x128xf32>
    %c25 = arith.constant 25 : index
    %c0_196 = arith.constant 0 : index
    %257 = vector.load %arg8[%c25, %c0_196] : memref<32x384xf32, #tpu.memory_space<vmem>>, vector<1x128xf32>
    tpu.vector_store %arg8[%c25, %c0_196], %256 {strides = array<i32>} : memref<32x384xf32, #tpu.memory_space<vmem>>, vector<1x128xf32>,
    %c24_197 = arith.constant 24 : index
    %c128_198 = arith.constant 128 : index
    %258 = vector.load %arg8[%c24_197, %c128_198] : memref<32x384xf32, #tpu.memory_space<vmem>>, vector<1x128xf32>
    tpu.vector_store %arg8[%c24_197, %c128_198], %256 {strides = array<i32>} : memref<32x384xf32, #tpu.memory_space<vmem>>, vector<1x128xf32>,
    %c23_199 = arith.constant 23 : index
    %c256_200 = arith.constant 256 : index
    %259 = vector.load %arg8[%c23_199, %c256_200] : memref<32x384xf32, #tpu.memory_space<vmem>>, vector<1x128xf32>
    tpu.vector_store %arg8[%c23_199, %c256_200], %256 {strides = array<i32>} : memref<32x384xf32, #tpu.memory_space<vmem>>, vector<1x128xf32>,
    %c26_i32 = arith.constant 26 : i32
    %260 = arith.addi %0, %c26_i32 : i32
    %261 = arith.index_cast %260 : i32 to index
    %262 = memref.load %arg1[%261] : memref<64xi32, #tpu.memory_space<smem>>
    %c0_i32_201 = arith.constant 0 : i32
    %263 = arith.maxsi %262, %c0_i32_201 : i32
    %c255_i32_202 = arith.constant 255 : i32
    %264 = arith.minsi %263, %c255_i32_202 : i32
    %265 = arith.index_cast %264 : i32 to index
    %c0_203 = arith.constant 0 : index
    %266 = vector.load %arg2[%265, %c0_203] : memref<256x128xf32, #tpu.memory_space<vmem>>, vector<1x128xf32>
    %c26 = arith.constant 26 : index
    %c0_204 = arith.constant 0 : index
    %267 = vector.load %arg8[%c26, %c0_204] : memref<32x384xf32, #tpu.memory_space<vmem>>, vector<1x128xf32>
    tpu.vector_store %arg8[%c26, %c0_204], %266 {strides = array<i32>} : memref<32x384xf32, #tpu.memory_space<vmem>>, vector<1x128xf32>,
    %c25_205 = arith.constant 25 : index
    %c128_206 = arith.constant 128 : index
    %268 = vector.load %arg8[%c25_205, %c128_206] : memref<32x384xf32, #tpu.memory_space<vmem>>, vector<1x128xf32>
    tpu.vector_store %arg8[%c25_205, %c128_206], %266 {strides = array<i32>} : memref<32x384xf32, #tpu.memory_space<vmem>>, vector<1x128xf32>,
    %c24_207 = arith.constant 24 : index
    %c256_208 = arith.constant 256 : index
    %269 = vector.load %arg8[%c24_207, %c256_208] : memref<32x384xf32, #tpu.memory_space<vmem>>, vector<1x128xf32>
    tpu.vector_store %arg8[%c24_207, %c256_208], %266 {strides = array<i32>} : memref<32x384xf32, #tpu.memory_space<vmem>>, vector<1x128xf32>,
    %c27_i32 = arith.constant 27 : i32
    %270 = arith.addi %0, %c27_i32 : i32
    %271 = arith.index_cast %270 : i32 to index
    %272 = memref.load %arg1[%271] : memref<64xi32, #tpu.memory_space<smem>>
    %c0_i32_209 = arith.constant 0 : i32
    %273 = arith.maxsi %272, %c0_i32_209 : i32
    %c255_i32_210 = arith.constant 255 : i32
    %274 = arith.minsi %273, %c255_i32_210 : i32
    %275 = arith.index_cast %274 : i32 to index
    %c0_211 = arith.constant 0 : index
    %276 = vector.load %arg2[%275, %c0_211] : memref<256x128xf32, #tpu.memory_space<vmem>>, vector<1x128xf32>
    %c27 = arith.constant 27 : index
    %c0_212 = arith.constant 0 : index
    %277 = vector.load %arg8[%c27, %c0_212] : memref<32x384xf32, #tpu.memory_space<vmem>>, vector<1x128xf32>
    tpu.vector_store %arg8[%c27, %c0_212], %276 {strides = array<i32>} : memref<32x384xf32, #tpu.memory_space<vmem>>, vector<1x128xf32>,
    %c26_213 = arith.constant 26 : index
    %c128_214 = arith.constant 128 : index
    %278 = vector.load %arg8[%c26_213, %c128_214] : memref<32x384xf32, #tpu.memory_space<vmem>>, vector<1x128xf32>
    tpu.vector_store %arg8[%c26_213, %c128_214], %276 {strides = array<i32>} : memref<32x384xf32, #tpu.memory_space<vmem>>, vector<1x128xf32>,
    %c25_215 = arith.constant 25 : index
    %c256_216 = arith.constant 256 : index
    %279 = vector.load %arg8[%c25_215, %c256_216] : memref<32x384xf32, #tpu.memory_space<vmem>>, vector<1x128xf32>
    tpu.vector_store %arg8[%c25_215, %c256_216], %276 {strides = array<i32>} : memref<32x384xf32, #tpu.memory_space<vmem>>, vector<1x128xf32>,
    %c28_i32 = arith.constant 28 : i32
    %280 = arith.addi %0, %c28_i32 : i32
    %281 = arith.index_cast %280 : i32 to index
    %282 = memref.load %arg1[%281] : memref<64xi32, #tpu.memory_space<smem>>
    %c0_i32_217 = arith.constant 0 : i32
    %283 = arith.maxsi %282, %c0_i32_217 : i32
    %c255_i32_218 = arith.constant 255 : i32
    %284 = arith.minsi %283, %c255_i32_218 : i32
    %285 = arith.index_cast %284 : i32 to index
    %c0_219 = arith.constant 0 : index
    %286 = vector.load %arg2[%285, %c0_219] : memref<256x128xf32, #tpu.memory_space<vmem>>, vector<1x128xf32>
    %c28 = arith.constant 28 : index
    %c0_220 = arith.constant 0 : index
    %287 = vector.load %arg8[%c28, %c0_220] : memref<32x384xf32, #tpu.memory_space<vmem>>, vector<1x128xf32>
    tpu.vector_store %arg8[%c28, %c0_220], %286 {strides = array<i32>} : memref<32x384xf32, #tpu.memory_space<vmem>>, vector<1x128xf32>,
    %c27_221 = arith.constant 27 : index
    %c128_222 = arith.constant 128 : index
    %288 = vector.load %arg8[%c27_221, %c128_222] : memref<32x384xf32, #tpu.memory_space<vmem>>, vector<1x128xf32>
    tpu.vector_store %arg8[%c27_221, %c128_222], %286 {strides = array<i32>} : memref<32x384xf32, #tpu.memory_space<vmem>>, vector<1x128xf32>,
    %c26_223 = arith.constant 26 : index
    %c256_224 = arith.constant 256 : index
    %289 = vector.load %arg8[%c26_223, %c256_224] : memref<32x384xf32, #tpu.memory_space<vmem>>, vector<1x128xf32>
    tpu.vector_store %arg8[%c26_223, %c256_224], %286 {strides = array<i32>} : memref<32x384xf32, #tpu.memory_space<vmem>>, vector<1x128xf32>,
    %c29_i32 = arith.constant 29 : i32
    %290 = arith.addi %0, %c29_i32 : i32
    %291 = arith.index_cast %290 : i32 to index
    %292 = memref.load %arg1[%291] : memref<64xi32, #tpu.memory_space<smem>>
    %c0_i32_225 = arith.constant 0 : i32
    %293 = arith.maxsi %292, %c0_i32_225 : i32
    %c255_i32_226 = arith.constant 255 : i32
    %294 = arith.minsi %293, %c255_i32_226 : i32
    %295 = arith.index_cast %294 : i32 to index
    %c0_227 = arith.constant 0 : index
    %296 = vector.load %arg2[%295, %c0_227] : memref<256x128xf32, #tpu.memory_space<vmem>>, vector<1x128xf32>
    %c29 = arith.constant 29 : index
    %c0_228 = arith.constant 0 : index
    %297 = vector.load %arg8[%c29, %c0_228] : memref<32x384xf32, #tpu.memory_space<vmem>>, vector<1x128xf32>
    tpu.vector_store %arg8[%c29, %c0_228], %296 {strides = array<i32>} : memref<32x384xf32, #tpu.memory_space<vmem>>, vector<1x128xf32>,
    %c28_229 = arith.constant 28 : index
    %c128_230 = arith.constant 128 : index
    %298 = vector.load %arg8[%c28_229, %c128_230] : memref<32x384xf32, #tpu.memory_space<vmem>>, vector<1x128xf32>
    tpu.vector_store %arg8[%c28_229, %c128_230], %296 {strides = array<i32>} : memref<32x384xf32, #tpu.memory_space<vmem>>, vector<1x128xf32>,
    %c27_231 = arith.constant 27 : index
    %c256_232 = arith.constant 256 : index
    %299 = vector.load %arg8[%c27_231, %c256_232] : memref<32x384xf32, #tpu.memory_space<vmem>>, vector<1x128xf32>
    tpu.vector_store %arg8[%c27_231, %c256_232], %296 {strides = array<i32>} : memref<32x384xf32, #tpu.memory_space<vmem>>, vector<1x128xf32>,
    %c30_i32 = arith.constant 30 : i32
    %300 = arith.addi %0, %c30_i32 : i32
    %301 = arith.index_cast %300 : i32 to index
    %302 = memref.load %arg1[%301] : memref<64xi32, #tpu.memory_space<smem>>
    %c0_i32_233 = arith.constant 0 : i32
    %303 = arith.maxsi %302, %c0_i32_233 : i32
    %c255_i32_234 = arith.constant 255 : i32
    %304 = arith.minsi %303, %c255_i32_234 : i32
    %305 = arith.index_cast %304 : i32 to index
    %c0_235 = arith.constant 0 : index
    %306 = vector.load %arg2[%305, %c0_235] : memref<256x128xf32, #tpu.memory_space<vmem>>, vector<1x128xf32>
    %c30 = arith.constant 30 : index
    %c0_236 = arith.constant 0 : index
    %307 = vector.load %arg8[%c30, %c0_236] : memref<32x384xf32, #tpu.memory_space<vmem>>, vector<1x128xf32>
    tpu.vector_store %arg8[%c30, %c0_236], %306 {strides = array<i32>} : memref<32x384xf32, #tpu.memory_space<vmem>>, vector<1x128xf32>,
    %c29_237 = arith.constant 29 : index
    %c128_238 = arith.constant 128 : index
    %308 = vector.load %arg8[%c29_237, %c128_238] : memref<32x384xf32, #tpu.memory_space<vmem>>, vector<1x128xf32>
    tpu.vector_store %arg8[%c29_237, %c128_238], %306 {strides = array<i32>} : memref<32x384xf32, #tpu.memory_space<vmem>>, vector<1x128xf32>,
    %c28_239 = arith.constant 28 : index
    %c256_240 = arith.constant 256 : index
    %309 = vector.load %arg8[%c28_239, %c256_240] : memref<32x384xf32, #tpu.memory_space<vmem>>, vector<1x128xf32>
    tpu.vector_store %arg8[%c28_239, %c256_240], %306 {strides = array<i32>} : memref<32x384xf32, #tpu.memory_space<vmem>>, vector<1x128xf32>,
    %c31_i32 = arith.constant 31 : i32
    %310 = arith.addi %0, %c31_i32 : i32
    %311 = arith.index_cast %310 : i32 to index
    %312 = memref.load %arg1[%311] : memref<64xi32, #tpu.memory_space<smem>>
    %c0_i32_241 = arith.constant 0 : i32
    %313 = arith.maxsi %312, %c0_i32_241 : i32
    %c255_i32_242 = arith.constant 255 : i32
    %314 = arith.minsi %313, %c255_i32_242 : i32
    %315 = arith.index_cast %314 : i32 to index
    %c0_243 = arith.constant 0 : index
    %316 = vector.load %arg2[%315, %c0_243] : memref<256x128xf32, #tpu.memory_space<vmem>>, vector<1x128xf32>
    %c31 = arith.constant 31 : index
    %c0_244 = arith.constant 0 : index
    %317 = vector.load %arg8[%c31, %c0_244] : memref<32x384xf32, #tpu.memory_space<vmem>>, vector<1x128xf32>
    tpu.vector_store %arg8[%c31, %c0_244], %316 {strides = array<i32>} : memref<32x384xf32, #tpu.memory_space<vmem>>, vector<1x128xf32>,
    %c30_245 = arith.constant 30 : index
    %c128_246 = arith.constant 128 : index
    %318 = vector.load %arg8[%c30_245, %c128_246] : memref<32x384xf32, #tpu.memory_space<vmem>>, vector<1x128xf32>
    tpu.vector_store %arg8[%c30_245, %c128_246], %316 {strides = array<i32>} : memref<32x384xf32, #tpu.memory_space<vmem>>, vector<1x128xf32>,
    %c29_247 = arith.constant 29 : index
    %c256_248 = arith.constant 256 : index
    %319 = vector.load %arg8[%c29_247, %c256_248] : memref<32x384xf32, #tpu.memory_space<vmem>>, vector<1x128xf32>
    tpu.vector_store %arg8[%c29_247, %c256_248], %316 {strides = array<i32>} : memref<32x384xf32, #tpu.memory_space<vmem>>, vector<1x128xf32>,
    %c0_249 = arith.constant 0 : index
    %c0_250 = arith.constant 0 : index
    %320 = vector.load %arg8[%c0_249, %c0_250] : memref<32x384xf32, #tpu.memory_space<vmem>>, vector<32x384xf32>
    %321 = arith.truncf %320 : vector<32x384xf32> to vector<32x384xbf16>
    %c0_251 = arith.constant 0 : index
    %c0_252 = arith.constant 0 : index
    %322 = vector.load %arg3[%c0_251, %c0_252] : memref<384x384xbf16, #tpu.memory_space<vmem>>, vector<384x384xbf16>
    %cst_253 = arith.constant dense<0.000000e+00> : vector<32x384xf32>
    %323 = tpu.matmul %321, %322, %cst_253 {dimension_numbers = #tpu.dot_dimension_numbers<[1], [1], [0], [0], [0, 0, 1, 0], [], []>} : vector<32x384xbf16>, vector<384x384xbf16>, vector<32x384xf32> -> vector<32x384xf32>
    %c0_254 = arith.constant 0 : index
    %c0_255 = arith.constant 0 : index
    %324 = vector.load %arg4[%c0_254, %c0_255] : memref<1x384xf32, #tpu.memory_space<vmem>>, vector<1x384xf32>
    %325 = vector.broadcast %324 : vector<1x384xf32> to vector<32x384xf32>
    %326 = arith.addf %323, %325 : vector<32x384xf32>
    %cst_256 = arith.constant 0.000000e+00 : f32
    %327 = vector.broadcast %cst_256 : f32 to vector<32x384xf32>
    %328 = arith.maximumf %326, %327 : vector<32x384xf32>
    %329 = vector.shape_cast %328 : vector<32x384xf32> to vector<2x16x384xf32>
    %330 = tpu.iota {dimensions = array<i32: 1>} : vector<2x16x384xi32>
    %331 = tpu.iota {dimensions = array<i32: 2>} : vector<2x16x384xi32>
    %c15_i32_257 = arith.constant 15 : i32
    %332 = vector.broadcast %c15_i32_257 : i32 to vector<2x16x384xi32>
    %c0_i32_258 = arith.constant 0 : i32
    %333 = vector.broadcast %c0_i32_258 : i32 to vector<2x16x384xi32>
    %334 = arith.cmpi sge, %331, %333 : vector<2x16x384xi32>
    %c128_i32 = arith.constant 128 : i32
    %335 = vector.broadcast %c128_i32 : i32 to vector<2x16x384xi32>
    %336 = arith.cmpi slt, %331, %335 : vector<2x16x384xi32>
    %337 = arith.andi %334, %336 : vector<2x16x384xi1>
    %c15_i32_259 = arith.constant 15 : i32
    %338 = vector.broadcast %c15_i32_259 : i32 to vector<2x16x384xi32>
    %339 = arith.select %337, %338, %332 : vector<2x16x384xi1>, vector<2x16x384xi32>
    %c128_i32_260 = arith.constant 128 : i32
    %340 = vector.broadcast %c128_i32_260 : i32 to vector<2x16x384xi32>
    %341 = arith.cmpi sge, %331, %340 : vector<2x16x384xi32>
    %c256_i32 = arith.constant 256 : i32
    %342 = vector.broadcast %c256_i32 : i32 to vector<2x16x384xi32>
    %343 = arith.cmpi slt, %331, %342 : vector<2x16x384xi32>
    %344 = arith.andi %341, %343 : vector<2x16x384xi1>
    %c14_i32_261 = arith.constant 14 : i32
    %345 = vector.broadcast %c14_i32_261 : i32 to vector<2x16x384xi32>
    %346 = arith.select %344, %345, %339 : vector<2x16x384xi1>, vector<2x16x384xi32>
    %c256_i32_262 = arith.constant 256 : i32
    %347 = vector.broadcast %c256_i32_262 : i32 to vector<2x16x384xi32>
    %348 = arith.cmpi sge, %331, %347 : vector<2x16x384xi32>
    %c384_i32 = arith.constant 384 : i32
    %349 = vector.broadcast %c384_i32 : i32 to vector<2x16x384xi32>
    %350 = arith.cmpi slt, %331, %349 : vector<2x16x384xi32>
    %351 = arith.andi %348, %350 : vector<2x16x384xi1>
    %c13_i32_263 = arith.constant 13 : i32
    %352 = vector.broadcast %c13_i32_263 : i32 to vector<2x16x384xi32>
    %353 = arith.select %351, %352, %346 : vector<2x16x384xi1>, vector<2x16x384xi32>
    %354 = arith.cmpi sle, %330, %353 : vector<2x16x384xi32>
    %cst_264 = arith.constant 0.000000e+00 : f32
    %355 = vector.broadcast %cst_264 : f32 to vector<2x16x384xf32>
    %356 = arith.select %354, %329, %355 : vector<2x16x384xi1>, vector<2x16x384xf32>
    %cst_265 = arith.constant dense<0xFF800000> : vector<2x384xf32>
    %357 = vector.multi_reduction <maximumf>, %356, %cst_265 [1] : vector<2x16x384xf32> to vector<2x384xf32>
    %358 = arith.truncf %357 : vector<2x384xf32> to vector<2x384xbf16>
    %c0_266 = arith.constant 0 : index
    %c0_267 = arith.constant 0 : index
    %359 = vector.load %arg5[%c0_266, %c0_267] : memref<128x384xbf16, #tpu.memory_space<vmem>>, vector<128x384xbf16>
    %cst_268 = arith.constant dense<0.000000e+00> : vector<2x128xf32>
    %360 = tpu.matmul %358, %359, %cst_268 {dimension_numbers = #tpu.dot_dimension_numbers<[1], [1], [0], [0], [0, 0, 1, 0], [], []>} : vector<2x384xbf16>, vector<128x384xbf16>, vector<2x128xf32> -> vector<2x128xf32>
    %c0_269 = arith.constant 0 : index
    %c0_270 = arith.constant 0 : index
    %361 = vector.load %arg6[%c0_269, %c0_270] : memref<1x128xf32, #tpu.memory_space<vmem>>, vector<1x128xf32>
    %362 = vector.broadcast %361 : vector<1x128xf32> to vector<2x128xf32>
    %363 = arith.addf %360, %362 : vector<2x128xf32>
    %c0_271 = arith.constant 0 : index
    %c0_272 = arith.constant 0 : index
    %c0_273 = arith.constant 0 : index
    %364 = vector.load %arg7[%c0_271, %c0_272, %c0_273] : memref<1x2x128xf32, #tpu.memory_space<vmem>>, vector<1x2x128xf32>
    %365 = vector.shape_cast %364 : vector<1x2x128xf32> to vector<2x128xf32>
    %366 = vector.shape_cast %363 : vector<2x128xf32> to vector<1x2x128xf32>
    tpu.vector_store %arg7[%c0_271, %c0_272, %c0_273], %366 {strides = array<i32>} : memref<1x2x128xf32, #tpu.memory_space<vmem>>, vector<1x2x128xf32>,
    return
  }
  func.func @transform_0(%arg0: i32, %arg1: memref<64xi32, #tpu.memory_space<smem>>) -> (i32, i32) {
    %c0_i32 = arith.constant 0 : i32
    %c0_i32_0 = arith.constant 0 : i32
    %c0_i32_1 = arith.constant 0 : i32
    return %c0_i32, %c0_i32_0 : i32, i32
  }
  func.func @transform_1(%arg0: i32, %arg1: memref<64xi32, #tpu.memory_space<smem>>) -> (i32, i32) {
    %c0_i32 = arith.constant 0 : i32
    %c0_i32_0 = arith.constant 0 : i32
    %c0_i32_1 = arith.constant 0 : i32
    return %c0_i32, %c0_i32_0 : i32, i32
  }
  func.func @transform_2(%arg0: i32, %arg1: memref<64xi32, #tpu.memory_space<smem>>) -> (i32, i32) {
    %c0_i32 = arith.constant 0 : i32
    %c0_i32_0 = arith.constant 0 : i32
    %c0_i32_1 = arith.constant 0 : i32
    return %c0_i32, %c0_i32_0 : i32, i32
  }
  func.func @transform_3(%arg0: i32, %arg1: memref<64xi32, #tpu.memory_space<smem>>) -> (i32, i32) {
    %c0_i32 = arith.constant 0 : i32
    %c0_i32_0 = arith.constant 0 : i32
    %c0_i32_1 = arith.constant 0 : i32
    return %c0_i32, %c0_i32_0 : i32, i32
  }
  func.func @transform_4(%arg0: i32, %arg1: memref<64xi32, #tpu.memory_space<smem>>) -> (i32, i32) {
    %c0_i32 = arith.constant 0 : i32
    %c0_i32_0 = arith.constant 0 : i32
    %c0_i32_1 = arith.constant 0 : i32
    return %c0_i32, %c0_i32_0 : i32, i32
  }
  func.func @transform_5(%arg0: i32, %arg1: memref<64xi32, #tpu.memory_space<smem>>) -> (i32, i32, i32) {
    %c0_i32 = arith.constant 0 : i32
    %c0_i32_0 = arith.constant 0 : i32
    %c0_i32_1 = arith.constant 0 : i32
    return %arg0, %c0_i32, %c0_i32_0 : i32, i32, i32
  }
}

</mosaic_0001>

<bundles_post_ra>
// kernel: tpu_custom_call.1
= control target key start
LH: loop header
LB: loop body
LE: loop exit
PB: predicated region body
PF: predicated region fallthrough
CT: control target
= control target key end

     0   :  { %s2804_s24 = smov [#allocation4]   ;;  %s3326_s0 = inlined_call_operand.hbm [shape: s32[64], index: 0, kind: input, shape index: {}]   ;;  %s3327_s1 = inlined_call_operand.hbm [shape: f32[256,128], index: 1, kind: input, shape index: {}]   ;;  %s3328_s2 = inlined_call_operand.hbm [shape: bf16[384,384], index: 2, kind: input, shape index: {}]   ;;  %s3329_s3 = inlined_call_operand.hbm [shape: f32[1,384], index: 3, kind: input, shape index: {}]   ;;  %s3330_s4 = inlined_call_operand.hbm [shape: bf16[128,384], index: 4, kind: input, shape index: {}]   ;;  %s3331_s5 = inlined_call_operand.vmem [shape: f32[1,128], index: 5, kind: input, shape index: {}]   ;;  %s3332_s6 = inlined_call_operand.hbm [shape: f32[2,2,128], index: 6, kind: output, shape index: {}]  }
   0x1   :  { %3333 = sst [smem:[#allocation19_spill]] %s3327_s1  ;;  %s12_s23 = sshll.u32 %s3326_s0, 4  ;;  %s13_s23 = int_to_ptr.hbm [resolvable:$true] %s12_s23 }
   0x2   :  { %3334 = sst [smem:[#allocation20_spill]] %s3328_s2 }
   0x3   :  { %15 = dma.hbm_to_smem %s13_s23, 16, %s2804_s24, [#allocation3] }
   0x4   :  { %2770 = dma.done.wait [#allocation3], 16 }
   0x5   :  { %2771 = vsyncadd [#allocation3], 4294967280 }
   0x6   :  { %18 = sfence }
   0x7   :  { %19 = vsyncpa [#allocation6], 0 }
   0x8   :  { %20 = vsyncpa [#allocation9], 0 }
   0x9   :  { %21 = vsyncpa [#allocation12], 0 }
   0xa   :  { %22 = vsyncpa [#allocation7], 0 }
   0xb   :  { %24 = vsyncpa [#allocation7 + $0x1], 0  ;;  %s2852_s25 = smov 0   ;;  %s2854_s26 = smov 0  }
   0xc   :  { %s2856_s27 = smov 0   ;;  %s2858_s28 = smov 0  }
   0xd LB: > { %s2873_s0 = sadd.s32 4294967295, %s2802_s28   ;;  %s1786_s29 = sadd.s32 4294967294, %s2802_s28   ;;  %s2802_s28 = sphi %s2858_s28, %s3344_s28   ;;  %s2798_s27 = sphi %s2856_s27, %s3343_s27   ;;  %s2794_s26 = sphi %s2854_s26, %s3342_s26   ;;  %s2790_s25 = sphi %s2852_s25, %s3341_s25  }
   0xe   : > { %s2877_s30 = sadd.s32 1, %s2802_s28   ;;  %s142_s7 = sadd.s32 1, %s2798_s27 }
   0xf   : > { %s139_s8 = ssub.s32 %s2802_s28, %s2877_s30  ;;  %p152_p0 = scmp.ne.s32.totalorder %s2798_s27, %s2794_s26 }
  0x10   : > { %p140_p1 = scmp.eq.s32.totalorder %s139_s8, 0  ;;  %p153_p2 = scmp.eq.s32.totalorder %s2873_s0, 1 }
  0x11   : > { %p158_p3 = scmp.ne.s32.totalorder %s2794_s26, %s2790_s25  ;;  %p159_p4 = scmp.eq.s32.totalorder %s1786_s29, 1 }
  0x12   : > { %s2888_s9 = scalar_select %p140_p1, %s2798_s27, %s142_s7  }
  0x13   : > { %p2890_p5 = por %p153_p2, %p152_p0  ;;  %p2894_p6 = por %p159_p4, %p158_p3 }
  0x14   : > { %p1787_p7 = scmp.ge.s32.totalorder %s2802_s28, 1  ;;  %p166_p8 = scmp.lt.s32.totalorder %s2802_s28, 3 }
  0x15   : > { %p2542_p9 = scmp.eq.s32.totalorder %s2873_s0, 0  ;;  %s3338_s2 = sld [smem:[#allocation20_spill]] }
  0x16   : > { %p2901_p10 = pnand %p1787_p7, %p166_p8  ;;  %s2805_s16 = smov [#allocation8]  }
  0x17   : > { %s193_s17 = sshll.u32 %s2805_s16, 4  ;;  %s3340_s1 = sld [smem:[#allocation19_spill]]  ;;  %s194_s17 = int_to_ptr.vmem [resolvable:$true] %s193_s17 }
  0x18   : > { %p2525_p11 = pneg %p2901_p10  ;;  %s2806_s22 = smov 192  }
  0x19   : > { %s2807_s23 = smov 12   ;;  %s2808_s24 = smov [#allocation5]  }
  0x1a   : > { %p2912_p12 = pnand %p2542_p9, %p2525_p11  ;;  %s179_s29 = sshll.u32 %s2808_s24, 4  ;;  %s180_s29 = int_to_ptr.vmem [resolvable:$true] %s179_s29 }
  0x1b   : > { %s191_s15 = sshll.u32 %s3338_s2, 4  ;;  %s2809_s7 = smov 128   ;;  %s192_s15 = int_to_ptr.hbm [resolvable:$true] %s191_s15 }
  0x1c   : > { %2531 = dma.hbm_to_vmem [thread:$0]  (!%p2912_p12), %s192_s15, 9216, %s194_s17, [#allocation9], %s2806_s22, %s2806_s22, %s2807_s23  }
  0x1d   : > { %s177_s21 = sshll.u32 %s3340_s1, 4  ;;  %s2810_s8 = smov 8   ;;  %s178_s21 = int_to_ptr.hbm [resolvable:$true] %s177_s21 }
  0x1e   : > { %2528 = dma.hbm_to_vmem [thread:$0]  (!%p2912_p12), %s178_s21, 4096, %s180_s29, [#allocation6], %s2809_s7, %s2809_s7, %s2810_s8  }
  0x1f   : > { %s206_s16 = sshll.u32 %s3329_s3, 4  ;;  %s2811_s19 = smov [#allocation10]   ;;  %s207_s16 = int_to_ptr.hbm [resolvable:$true] %s206_s16 }
  0x20   : > { %s208_s20 = sshll.u32 %s2811_s19, 4  ;;  %s217_s15 = sshll.u32 %s3330_s4, 4  ;;  %s209_s20 = int_to_ptr.vmem [resolvable:$true] %s208_s20  ;;  %s218_s15 = int_to_ptr.hbm [resolvable:$true] %s217_s15 }
  0x21   : > { %2534 = dma.hbm_to_vmem [thread:$0]  (!%p2912_p12), %s207_s16, 48, %s209_s20, [#allocation9]  }
  0x22   : > { %s2812_s17 = smov [#allocation11]   ;;  %238 = sbr.rel (%p2901_p10) target bundleno = 555 (0x22b), region = 40 }
  0x23   : > { %s219_s24 = sshll.u32 %s2812_s17, 4  ;;  %s220_s24 = int_to_ptr.vmem [resolvable:$true] %s219_s24 }
  0x24   : > { %2537 = dma.hbm_to_vmem [thread:$0]  (!%p2912_p12), %s218_s15, 3072, %s220_s24, [#allocation12], %s2806_s22, %s2806_s22, %s2807_s23  }
  0x27   : > { %2773 = dma.done.wait (%p2542_p9), [#allocation6], 4096  }
  0x28   : > { %2775 = vsyncadd (%p2542_p9), [#allocation6], 4294963200 }
  0x29   : > { %2777 = dma.done.wait (%p2542_p9), [#allocation9], 9264  }
  0x2a   : > { %2779 = vsyncadd (%p2542_p9), [#allocation9], 4294958032 }
  0x2b   : > { %2781 = dma.done.wait (%p2542_p9), [#allocation12], 3072  }
  0x2c   : > { %2783 = vsyncadd (%p2542_p9), [#allocation12], 4294964224  ;;  %s2948_s1 = sshll.u32 %s2873_s0, 5  ;;  %v2045_v0 = vld [vmem:[#allocation8 + $0xa8] sm:$0xf]  ;;  %v2813_v56 = vmov 0.0  }
  0x2d   : > { %v2433_v1 = vld [vmem:[#allocation8 + $0xb0] sm:$0xf0]  ;;  %v2432_v2 = vld [vmem:[#allocation8 + $0xac] sm:$0xf]  ;;  %v2047_v4 = vld [vmem:[#allocation8 + $0xb4] sm:$0xf0] }
  0x2e   : > { %v2046_v3 = vor.u32 %v2433_v1, %v2045_v0  ;;  %s308_s2 = sadd.s32 2, %s2948_s1  ;;  %v2050_v5 = vor.u32 %v2432_v2, %v2047_v4  ;;  %v2053_v6 = vld [vmem:[#allocation8 + $0xb0] sm:$0xf]  ;;  %v2434_v7 = vld [vmem:[#allocation8 + $0xb8] sm:$0xf0]  ;;  %s319_s12 = sadd.s32 3, %s2948_s1 }
  0x2f   : > { %v2033_v8 = vld [vmem:[#allocation8 + $0x90] sm:$0xf]  ;;  %v2430_v9 = vld [vmem:[#allocation8 + $0x98] sm:$0xf0]  ;;  %v2054_v10 = vor.u32 %v2434_v7, %v2053_v6  ;;  %s2952_s18 = sld [smem:[#allocation4 + %s308_s2]]  ;;  %s330_s22 = sadd.s32 4, %s2948_s1 }
  0x30   : > { %1144 = vmatpush.bf16.xpose.msra.mxu0 %v2046_v3  ;;  %1163 = vmatpush.bf16.xpose.msra.mxu1 %v2050_v5  ;;  %v2429_v11 = vld [vmem:[#allocation8 + $0x94] sm:$0xf]  ;;  %v2035_v12 = vld [vmem:[#allocation8 + $0x9c] sm:$0xf0]  ;;  %s2954_s21 = sld [smem:[#allocation4 + %s319_s12]]  ;;  %v2034_v13 = vor.u32 %v2430_v9, %v2033_v8  ;;  %s341_s23 = sadd.s32 5, %s2948_s1 }
  0x31   : > { %1182 = vmatpush.bf16.xpose.msra.mxu2 %v2054_v10  ;;  %v2041_v14 = vld [vmem:[#allocation8 + $0x98] sm:$0xf]  ;;  %v2431_v15 = vld [vmem:[#allocation8 + $0xa0] sm:$0xf0]  ;;  %v2038_v16 = vor.u32 %v2429_v11, %v2035_v12  ;;  %v2141_v18 = vld [vmem:[#allocation8 + $0x168] sm:$0xf] }
  0x32   : > { %v2042_v17 = vor.u32 %v2431_v15, %v2041_v14  ;;  %v2457_v19 = vld [vmem:[#allocation8 + $0x170] sm:$0xf0]  ;;  %s2958_s29 = sld [smem:[#allocation4 + %s330_s22]]  ;;  %v2021_v21 = vld [vmem:[#allocation8 + $0x78] sm:$0xf]  ;;  %s352_s13 = sadd.s32 6, %s2948_s1 }
  0x33   : > { %v2142_v20 = vor.u32 %v2457_v19, %v2141_v18  ;;  %v2427_v22 = vld [vmem:[#allocation8 + $0x80] sm:$0xf0]  ;;  %s2961_s7 = sld [smem:[#allocation4 + %s341_s23]]  ;;  %v2426_v23 = vld [vmem:[#allocation8 + $0x7c] sm:$0xf]  ;;  %s363_s20 = sadd.s32 7, %s2948_s1 }
  0x34   : > { %v2023_v24 = vld [vmem:[#allocation8 + $0x84] sm:$0xf0]  ;;  %v2022_v25 = vor.u32 %v2427_v22, %v2021_v21  ;;  %v2029_v26 = vld [vmem:[#allocation8 + $0x80] sm:$0xf]  ;;  %v2428_v27 = vld [vmem:[#allocation8 + $0x88] sm:$0xf0] }
  0x35   : > { %p310_p13 = scmp.gt.s32.totalorder %s2952_s18, 0  ;;  %1201 = vmatpush.bf16.xpose.msra.mxu3 %v2142_v20  ;;  %p1809_p0 = scmp.lt.s32.totalorder %s2952_s18, 255  ;;  %v2026_v28 = vor.u32 %v2426_v23, %v2023_v24  ;;  %v2129_v29 = vld [vmem:[#allocation8 + $0x150] sm:$0xf]  ;;  %v2454_v30 = vld [vmem:[#allocation8 + $0x158] sm:$0xf0]  ;;  %v2030_v31 = vor.u32 %v2428_v27, %v2029_v26 }
  0x36   : > { %p321_p1 = scmp.gt.s32.totalorder %s2954_s21, 0  ;;  %p1814_p2 = scmp.lt.s32.totalorder %s2954_s21, 255  ;;  %v2130_v32 = vor.u32 %v2454_v30, %v2129_v29  ;;  %v2009_v33 = vld [vmem:[#allocation8 + $0x60] sm:$0xf]  ;;  %v2424_v34 = vld [vmem:[#allocation8 + $0x68] sm:$0xf0] }
  0x37   : > { %s311_s8 = scalar_select %p310_p13, %s2952_s18, 0  ;;  %v2423_v35 = vld [vmem:[#allocation8 + $0x64] sm:$0xf]  ;;  %v2011_v36 = vld [vmem:[#allocation8 + $0x6c] sm:$0xf0]  ;;  %v2010_v37 = vor.u32 %v2424_v34, %v2009_v33  ;;  %280 = vst [vmem:[#allocation2 + $0x10] sm:$0xff] %v2813_v56 }
  0x38   : > { %1145 = vmatpush.bf16.xpose.msra.mxu0 %v2034_v13  ;;  %1164 = vmatpush.bf16.xpose.msra.mxu1 %v2038_v16  ;;  %s322_s14 = scalar_select %p321_p1, %s2954_s21, 0  ;;  %v2017_v38 = vld [vmem:[#allocation8 + $0x68] sm:$0xf]  ;;  %v2425_v39 = vld [vmem:[#allocation8 + $0x70] sm:$0xf0]  ;;  %v2014_v40 = vor.u32 %v2423_v35, %v2011_v36  ;;  %283 = vst [vmem:[#allocation2 + $0x28] sm:$0xff] %v2813_v56 }
  0x39   : > { %1183 = vmatpush.bf16.xpose.msra.mxu2 %v2042_v17  ;;  %s3346_s8 = smov (!%p1809_p0, %s311_s8), 255  ;;  %p332_p3 = scmp.gt.s32.totalorder %s2958_s29, 0  ;;  %v2117_v41 = vld [vmem:[#allocation8 + $0x138] sm:$0xf]  ;;  %v2451_v42 = vld [vmem:[#allocation8 + $0x140] sm:$0xf0]  ;;  %v2018_v43 = vor.u32 %v2425_v39, %v2017_v38 }
  0x3a   : > { %s2974_s16 = sld [smem:[#allocation4 + %s352_s13]]  ;;  %p1819_p4 = scmp.lt.s32.totalorder %s2958_s29, 255  ;;  %v2118_v44 = vor.u32 %v2451_v42, %v2117_v41  ;;  %v1997_v45 = vld [vmem:[#allocation8 + $0x48] sm:$0xf]  ;;  %v2421_v46 = vld [vmem:[#allocation8 + $0x50] sm:$0xf0] }
  0x3b   : > { %p343_p7 = scmp.gt.s32.totalorder %s2961_s7, 0  ;;  %s3348_s29 = smov (!%p332_p3, %s2958_s29), 0  ;;  %v2420_v47 = vld [vmem:[#allocation8 + $0x4c] sm:$0xf]  ;;  %v1999_v48 = vld [vmem:[#allocation8 + $0x54] sm:$0xf0]  ;;  %v1998_v51 = vor.u32 %v2421_v46, %v1997_v45 }
  0x3c   : > { %s3350_s14 = smov (!%p1814_p2, %s322_s14), 255  ;;  %p1824_p8 = scmp.lt.s32.totalorder %s2961_s7, 255  ;;  %v2105_v49 = vld [vmem:[#allocation8 + $0x120] sm:$0xf]  ;;  %v2448_v50 = vld [vmem:[#allocation8 + $0x128] sm:$0xf0]  ;;  %v2002_v54 = vor.u32 %v2420_v47, %v1999_v48 }
  0x3d   : > { %1202 = vmatpush.bf16.xpose.msra.mxu3 %v2130_v32  ;;  %s3352_s29 = smov (!%p1819_p4, %s3348_s29), 255  ;;  %s374_s15 = sadd.s32 8, %s2948_s1  ;;  %v2005_v52 = vld [vmem:[#allocation8 + $0x50] sm:$0xf]  ;;  %v2422_v53 = vld [vmem:[#allocation8 + $0x58] sm:$0xf0]  ;;  %v2106_v55 = vor.u32 %v2448_v50, %v2105_v49 }
  0x3e   : > { %s344_s19 = scalar_select %p343_p7, %s2961_s7, 0  ;;  %v1985_v59 = vld [vmem:[#allocation8 + $0x30] sm:$0xf]  ;;  %v2418_v60 = vld [vmem:[#allocation8 + $0x38] sm:$0xf0]  ;;  %v2006_v61 = vor.u32 %v2422_v53, %v2005_v52  ;;  %278 = vst [vmem:[#allocation2] sm:$0xff] %v2813_v56 }
  0x3f   : > { %s314_s24 = scalar_lea.vmem [#allocation5], %s3346_s8  ;;  %s325_s2 = scalar_lea.vmem [#allocation5], %s3350_s14  ;;  %v2417_v62 = vld [vmem:[#allocation8 + $0x34] sm:$0xf]  ;;  %v1987_v63 = vld [vmem:[#allocation8 + $0x3c] sm:$0xf0]  ;;  %v1986_v4 = vor.u32 %v2418_v60, %v1985_v59 }
  0x40   : > { %1146 = vmatpush.bf16.xpose.msra.mxu0 %v2022_v25  ;;  %1165 = vmatpush.bf16.xpose.msra.mxu1 %v2026_v28  ;;  %p354_p9 = scmp.gt.s32.totalorder %s2974_s16, 0  ;;  %s3354_s19 = smov (!%p1824_p8, %s344_s19), 255  ;;  %v3000_v57 = vld [vmem:[%s314_s24] sm:$0x1]  ;;  %v1993_v2 = vld [vmem:[#allocation8 + $0x38] sm:$0xf]  ;;  %v1990_v6 = vor.u32 %v2417_v62, %v1987_v63 }
  0x41   : > { %1184 = vmatpush.bf16.xpose.msra.mxu2 %v2030_v31  ;;  %p1829_p10 = scmp.lt.s32.totalorder %s2974_s16, 255  ;;  %v3003_v58 = vld [vmem:[%s325_s2] sm:$0x1]  ;;  %s3005_s12 = sld [smem:[#allocation4 + %s363_s20]]  ;;  %318 = vst [vmem:[#allocation2 + $0x10] sm:$0x1] %v3000_v57 }
  0x42   : > { %s355_s17 = scalar_select %p354_p9, %s2974_s16, 0  ;;  %329 = vst [vmem:[#allocation2 + $0x11] sm:$0x1] %v3003_v58  ;;  %v2419_v5 = vld [vmem:[#allocation8 + $0x40] sm:$0xf0]  ;;  %vm1472_vm1 = vcmask 1041409  }
  0x43   : > { %s336_s18 = scalar_lea.vmem [#allocation5], %s3352_s29  ;;  %s347_s21 = scalar_lea.vmem [#allocation5], %s3354_s19  ;;  %279 = vst [vmem:[#allocation2 + $0x8] sm:$0xff] %v2813_v56  ;;  %v1994_v7 = vor.u32 %v2419_v5, %v1993_v2  ;;  %v1973_v8 = vld [vmem:[#allocation8 + $0x18] sm:$0xf] }
  0x44   : > { %s3356_s17 = smov (!%p1829_p10, %s355_s17), 255  ;;  %v3011_v0 = vld [vmem:[%s336_s18] sm:$0x1]  ;;  %s3019_s22 = sld [smem:[#allocation4 + %s374_s15]]  ;;  %281 = vst [vmem:[#allocation2 + $0x18] sm:$0xff] %v2813_v56 }
  0x45   : > { %1203 = vmatpush.bf16.xpose.msra.mxu3 %v2118_v44  ;;  %v3014_v1 = vld [vmem:[%s347_s21] sm:$0x1]  ;;  %340 = vst [vmem:[#allocation2 + $0x12] sm:$0x1] %v3011_v0  ;;  %s358_s23 = scalar_lea.vmem [#allocation5], %s3356_s17  ;;  %s385_s29 = sadd.s32 9, %s2948_s1 }
  0x46   : > { %351 = vst [vmem:[#allocation2 + $0x13] sm:$0x1] %v3014_v1  ;;  %v3022_v3 = vld [vmem:[%s358_s23] sm:$0x1]  ;;  %s396_s7 = sadd.s32 10, %s2948_s1  ;;  %s3029_s8 = sld [smem:[#allocation4 + %s385_s29]] }
  0x47   : > { %362 = vst [vmem:[#allocation2 + $0x14] sm:$0x1] %v3022_v3  ;;  %p365_p11 = scmp.gt.s32.totalorder %s3005_s12, 0  ;;  %p1834_p12 = scmp.lt.s32.totalorder %s3005_s12, 255  ;;  %v2415_v9 = vld [vmem:[#allocation8 + $0x20] sm:$0xf0] }
  0x48   : > { %1147 = vmatpush.bf16.xpose.msra.mxu0 %v2010_v37  ;;  %1166 = vmatpush.bf16.xpose.msra.mxu1 %v2014_v40  ;;  %s407_s13 = sadd.s32 11, %s2948_s1  ;;  %s3035_s16 = sld [smem:[#allocation4 + %s396_s7]]  ;;  %282 = vst [vmem:[#allocation2 + $0x20] sm:$0xff] %v2813_v56  ;;  %v2414_v10 = vld [vmem:[#allocation8 + $0x1c] sm:$0xf]  ;;  %v1974_v14 = vor.u32 %v2415_v9, %v1973_v8 }
  0x49   : > { %1185 = vmatpush.bf16.xpose.msra.mxu2 %v2018_v43  ;;  %s366_s14 = scalar_select %p365_p11, %s3005_s12, 0  ;;  %284 = vst [vmem:[#allocation2 + $0x30] sm:$0xff] %v2813_v56  ;;  %v1975_v11 = vld [vmem:[#allocation8 + $0x24] sm:$0xf0]  ;;  %v1981_v12 = vld [vmem:[#allocation8 + $0x20] sm:$0xf] }
  0x4a   : > { %s418_s19 = sadd.s32 12, %s2948_s1  ;;  %p376_p13 = scmp.gt.s32.totalorder %s3019_s22, 0  ;;  %285 = vst [vmem:[#allocation2 + $0x38] sm:$0xff] %v2813_v56  ;;  %v2416_v15 = vld [vmem:[#allocation8 + $0x28] sm:$0xf0]  ;;  %v1978_v16 = vor.u32 %v2414_v10, %v1975_v11 }
  0x4b   : > { %s3358_s14 = smov (!%p1834_p12, %s366_s14), 255  ;;  %p1839_p0 = scmp.lt.s32.totalorder %s3019_s22, 255  ;;  %286 = vst [vmem:[#allocation2 + $0x40] sm:$0xff] %v2813_v56  ;;  %v1961_v17 = vld [vmem:[#allocation8] sm:$0xf]  ;;  %v1982_v19 = vor.u32 %v2416_v15, %v1981_v12 }
  0x4c   : > { %s3045_s20 = sld [smem:[#allocation4 + %s407_s13]]  ;;  %s369_s15 = scalar_lea.vmem [#allocation5], %s3358_s14  ;;  %287 = vst [vmem:[#allocation2 + $0x48] sm:$0xff] %v2813_v56  ;;  %v2412_v18 = vld [vmem:[#allocation8 + $0x8] sm:$0xf0] }
  0x4d   : > { %1204 = vmatpush.bf16.xpose.msra.mxu3 %v2106_v55  ;;  %v3048_v13 = vld [vmem:[%s369_s15] sm:$0x1]  ;;  %s377_s17 = scalar_select %p376_p13, %s3019_s22, 0  ;;  %288 = vst [vmem:[#allocation2 + $0x50] sm:$0xff] %v2813_v56  ;;  %v2456_v20 = vld [vmem:[#allocation8 + $0x16c] sm:$0xf]  ;;  %v1962_v29 = vor.u32 %v2412_v18, %v1961_v17 }
  0x4e   : > { %373 = vst [vmem:[#allocation2 + $0x15] sm:$0x1] %v3048_v13  ;;  %p387_p1 = scmp.gt.s32.totalorder %s3029_s8, 0  ;;  %p1844_p2 = scmp.lt.s32.totalorder %s3029_s8, 255  ;;  %v2143_v21 = vld [vmem:[#allocation8 + $0x174] sm:$0xf0] }
  0x4f   : > { %s3360_s17 = smov (!%p1839_p0, %s377_s17), 255  ;;  %p398_p3 = scmp.gt.s32.totalorder %s3035_s16, 0  ;;  %289 = vst [vmem:[#allocation2 + $0x58] sm:$0xff] %v2813_v56  ;;  %v2411_v22 = vld [vmem:[#allocation8 + $0x4] sm:$0xf]  ;;  %v2146_v31 = vor.u32 %v2456_v20, %v2143_v21 }
  0x50   : > { %1148 = vmatpush.bf16.xpose.msra.mxu0 %v1998_v51  ;;  %1167 = vmatpush.bf16.xpose.msra.mxu1 %v2002_v54  ;;  %s388_s24 = scalar_select %p387_p1, %s3029_s8, 0  ;;  %v1963_v23 = vld [vmem:[#allocation8 + $0xc] sm:$0xf0]  ;;  %316 = vst [vmem:[#allocation2 + $0x2] sm:$0x1] %v3000_v57 }
  0x51   : > { %1186 = vmatpush.bf16.xpose.msra.mxu2 %v2006_v61  ;;  %s380_s2 = scalar_lea.vmem [#allocation5], %s3360_s17  ;;  %v2149_v25 = vld [vmem:[#allocation8 + $0x170] sm:$0xf]  ;;  %v2458_v26 = vld [vmem:[#allocation8 + $0x178] sm:$0xf0]  ;;  %p1849_p4 = scmp.lt.s32.totalorder %s3035_s16, 255  ;;  %v1966_v32 = vor.u32 %v2411_v22, %v1963_v23 }
  0x52   : > { %v3062_v24 = vld [vmem:[%s380_s2] sm:$0x1]  ;;  %s3362_s24 = smov (!%p1844_p2, %s388_s24), 255  ;;  %v1969_v27 = vld [vmem:[#allocation8 + $0x8] sm:$0xf]  ;;  %p409_p7 = scmp.gt.s32.totalorder %s3045_s20, 0  ;;  %v2150_v33 = vor.u32 %v2458_v26, %v2149_v25 }
  0x53   : > { %384 = vst [vmem:[#allocation2 + $0x16] sm:$0x1] %v3062_v24  ;;  %s399_s12 = scalar_select %p398_p3, %s3035_s16, 0  ;;  %v2413_v30 = vld [vmem:[#allocation8 + $0x10] sm:$0xf0] }
  0x54   : > { %317 = vst [vmem:[#allocation2 + $0x9] sm:$0x1] %v3000_v57  ;;  %s391_s18 = scalar_lea.vmem [#allocation5], %s3362_s24  ;;  %p1854_p8 = scmp.lt.s32.totalorder %s3045_s20, 255  ;;  %v1970_v34 = vor.u32 %v2413_v30, %v1969_v27  ;;  %v2453_v36 = vld [vmem:[#allocation8 + $0x154] sm:$0xf] }
  0x55   : > { %v3073_v28 = vld [vmem:[%s391_s18] sm:$0x1]  ;;  %327 = vst [vmem:[#allocation2 + $0x3] sm:$0x1] %v3003_v58  ;;  %s3364_s12 = smov (!%p1849_p4, %s399_s12), 255  ;;  %s3083_s22 = sld [smem:[#allocation4 + %s418_s19]] }
  0x56   : > { %395 = vst [vmem:[#allocation2 + $0x17] sm:$0x1] %v3073_v28  ;;  %s410_s21 = scalar_select %p409_p7, %s3045_s20, 0  ;;  %v2131_v37 = vld [vmem:[#allocation8 + $0x15c] sm:$0xf0] }
  0x57   : > { %328 = vst [vmem:[#allocation2 + $0xa] sm:$0x1] %v3003_v58  ;;  %s402_s23 = scalar_lea.vmem [#allocation5], %s3364_s12  ;;  %s429_s29 = sadd.s32 13, %s2948_s1  ;;  %v2137_v38 = vld [vmem:[#allocation8 + $0x158] sm:$0xf]  ;;  %v2134_v41 = vor.u32 %v2453_v36, %v2131_v37 }
  0x58   : > { %1149 = vmatpush.bf16.xpose.msra.mxu0 %v1986_v4  ;;  %1168 = vmatpush.bf16.xpose.msra.mxu1 %v1990_v6  ;;  %338 = vst [vmem:[#allocation2 + $0x4] sm:$0x1] %v3011_v0  ;;  %v3086_v35 = vld [vmem:[%s402_s23] sm:$0x1]  ;;  %s3366_s21 = smov (!%p1854_p8, %s410_s21), 255  ;;  %s440_s7 = sadd.s32 14, %s2948_s1 }
  0x59   : > { %1187 = vmatpush.bf16.xpose.msra.mxu2 %v1994_v7  ;;  %339 = vst [vmem:[#allocation2 + $0xb] sm:$0x1] %v3011_v0  ;;  %s3094_s8 = sld [smem:[#allocation4 + %s429_s29]]  ;;  %s413_s13 = scalar_lea.vmem [#allocation5], %s3366_s21  ;;  %v2455_v40 = vld [vmem:[#allocation8 + $0x160] sm:$0xf0] }
  0x5a   : > { %406 = vst [vmem:[#allocation2 + $0x28] sm:$0x1] %v3086_v35  ;;  %v414_v39 = vld [vmem:[%s413_s13] sm:$0x1]  ;;  %s3097_s14 = sld [smem:[#allocation4 + %s440_s7]]  ;;  %s451_s16 = sadd.s32 15, %s2948_s1  ;;  %v2138_v42 = vor.u32 %v2455_v40, %v2137_v38 }
  0x5b   : > { %349 = vst [vmem:[#allocation2 + $0x5] sm:$0x1] %v3014_v1  ;;  %s3101_s19 = sld [smem:[#allocation4 + %s451_s16]]  ;;  %s462_s20 = sadd.s32 16, %s2948_s1  ;;  %v2093_v43 = vld [vmem:[#allocation8 + $0x108] sm:$0xf] }
  0x5c   : > { %350 = vst [vmem:[#allocation2 + $0xc] sm:$0x1] %v3014_v1  ;;  %p420_p9 = scmp.gt.s32.totalorder %s3083_s22, 0  ;;  %p1859_p10 = scmp.lt.s32.totalorder %s3083_s22, 255  ;;  %v2445_v44 = vld [vmem:[#allocation8 + $0x110] sm:$0xf0] }
  0x5d   : > { %417 = vst [vmem:[#allocation2 + $0x29] sm:$0x1] %v414_v39  ;;  %s3107_s15 = sld [smem:[#allocation4 + %s462_s20]]  ;;  %s473_s17 = sadd.s32 17, %s2948_s1  ;;  %v2094_v46 = vor.u32 %v2445_v44, %v2093_v43  ;;  %v2450_v47 = vld [vmem:[#allocation8 + $0x13c] sm:$0xf] }
  0x5e   : > { %360 = vst [vmem:[#allocation2 + $0x6] sm:$0x1] %v3022_v3  ;;  %s3368_s22 = smov (!%p420_p9, %s3083_s22), 0  ;;  %v2119_v48 = vld [vmem:[#allocation8 + $0x144] sm:$0xf0]  ;;  %s3134_s23 = sld [smem:[#allocation4 + %s473_s17]] }
  0x5f   : > { %361 = vst [vmem:[#allocation2 + $0xd] sm:$0x1] %v3022_v3  ;;  %p431_p11 = scmp.gt.s32.totalorder %s3094_s8, 0  ;;  %p1864_p12 = scmp.lt.s32.totalorder %s3094_s8, 255  ;;  %1205 = vmatpush.bf16.xpose.msra.mxu3 %v2094_v46  ;;  %v2122_v50 = vor.u32 %v2450_v47, %v2119_v48  ;;  %v2125_v51 = vld [vmem:[#allocation8 + $0x140] sm:$0xf] }
  0x60   : > { %1150 = vmatpush.bf16.xpose.msra.mxu0 %v1974_v14  ;;  %1169 = vmatpush.bf16.xpose.msra.mxu1 %v1978_v16  ;;  %371 = vst [vmem:[#allocation2 + $0x7] sm:$0x1] %v3048_v13  ;;  %s3370_s22 = smov (!%p1859_p10, %s3368_s22), 255  ;;  %p442_p13 = scmp.gt.s32.totalorder %s3097_s14, 0  ;;  %v2452_v53 = vld [vmem:[#allocation8 + $0x148] sm:$0xf0] }
  0x61   : > { %1188 = vmatpush.bf16.xpose.msra.mxu2 %v1982_v19  ;;  %372 = vst [vmem:[#allocation2 + $0xe] sm:$0x1] %v3048_v13  ;;  %s3372_s8 = smov (!%p431_p11, %s3094_s8), 0  ;;  %s424_s24 = scalar_lea.vmem [#allocation5], %s3370_s22  ;;  %v2126_v54 = vor.u32 %v2452_v53, %v2125_v51  ;;  %v2081_v56 = vld [vmem:[#allocation8 + $0xf0] sm:$0xf] }
  0x62   : > { %382 = vst [vmem:[#allocation2 + $0x18] sm:$0x1] %v3062_v24  ;;  %v425_v45 = vld [vmem:[%s424_s24] sm:$0x1]  ;;  %s3374_s8 = smov (!%p1864_p12, %s3372_s8), 255  ;;  %p1869_p0 = scmp.lt.s32.totalorder %s3097_s14, 255 }
  0x63   : > { %383 = vst [vmem:[#allocation2 + $0xf] sm:$0x1] %v3062_v24  ;;  %s443_s2 = scalar_select %p442_p13, %s3097_s14, 0  ;;  %v2442_v57 = vld [vmem:[#allocation8 + $0xf8] sm:$0xf0]  ;;  %v640_v4 = vld [vmem:[#allocation2 + $0x10] sm:$0xff] }
  0x64   : > { %393 = vst [vmem:[#allocation2 + $0x19] sm:$0x1] %v3073_v28  ;;  %s435_s12 = scalar_lea.vmem [#allocation5], %s3374_s8  ;;  %p453_p1 = scmp.gt.s32.totalorder %s3101_s19, 0  ;;  %v2082_v58 = vor.u32 %v2442_v57, %v2081_v56  ;;  %v2447_v59 = vld [vmem:[#allocation8 + $0x124] sm:$0xf] }
  0x65   : > { %428 = vst [vmem:[#allocation2 + $0x2a] sm:$0x1] %v425_v45  ;;  %v436_v49 = vld [vmem:[%s435_s12] sm:$0x1]  ;;  %p1874_p2 = scmp.lt.s32.totalorder %s3101_s19, 255  ;;  %s3376_s2 = smov (!%p1869_p0, %s443_s2), 255 }
  0x66   : > { %394 = vst [vmem:[#allocation2 + $0x20] sm:$0x1] %v3073_v28  ;;  %s3378_s19 = smov (!%p453_p1, %s3101_s19), 0  ;;  %p464_p3 = scmp.gt.s32.totalorder %s3107_s15, 0  ;;  %v2107_v61 = vld [vmem:[#allocation8 + $0x12c] sm:$0xf0] }
  0x67   : > { %404 = vst [vmem:[#allocation2 + $0x1a] sm:$0x1] %v3086_v35  ;;  %s446_s18 = scalar_lea.vmem [#allocation5], %s3376_s2  ;;  %s3380_s19 = smov (!%p1874_p2, %s3378_s19), 255  ;;  %1206 = vmatpush.bf16.xpose.msra.mxu3 %v2082_v58  ;;  %v2110_v62 = vor.u32 %v2447_v59, %v2107_v61  ;;  %v2113_v63 = vld [vmem:[#allocation8 + $0x128] sm:$0xf] }
  0x68   : > { %1151 = vmatpush.bf16.xpose.msra.mxu0 %v1962_v29  ;;  %1170 = vmatpush.bf16.xpose.msra.mxu1 %v1966_v32  ;;  %439 = vst [vmem:[#allocation2 + $0x2b] sm:$0x1] %v436_v49  ;;  %v447_v52 = vld [vmem:[%s446_s18] sm:$0x1]  ;;  %s465_s21 = scalar_select %p464_p3, %s3107_s15, 0 }
  0x69   : > { %1189 = vmatpush.bf16.xpose.msra.mxu2 %v1970_v34  ;;  %405 = vst [vmem:[#allocation2 + $0x21] sm:$0x1] %v3086_v35  ;;  %p1879_p4 = scmp.lt.s32.totalorder %s3107_s15, 255  ;;  %s457_s22 = scalar_lea.vmem [#allocation5], %s3380_s19  ;;  %v2449_v0 = vld [vmem:[#allocation8 + $0x130] sm:$0xf0] }
  0x6a   : > { %415 = vst [vmem:[#allocation2 + $0x1b] sm:$0x1] %v414_v39  ;;  %v458_v55 = vld [vmem:[%s457_s22] sm:$0x1]  ;;  %s298_s29 = sadd.s32 1, %s2948_s1  ;;  %s3138_s7 = sld [smem:[#allocation4 + %s2948_s1]]  ;;  %v2114_v1 = vor.u32 %v2449_v0, %v2113_v63 }
  0x6b   : > { %416 = vst [vmem:[#allocation2 + $0x22] sm:$0x1] %v414_v39  ;;  %s3382_s21 = smov (!%p1879_p4, %s465_s21), 255  ;;  %s484_s8 = sadd.s32 18, %s2948_s1  ;;  %v2069_v22 = vld [vmem:[#allocation8 + $0xd8] sm:$0xf] }
  0x6c   : > { %450 = vst [vmem:[#allocation2 + $0x2c] sm:$0x1] %v447_v52  ;;  %s3141_s13 = sld [smem:[#allocation4 + %s298_s29]]  ;;  %s468_s14 = scalar_lea.vmem [#allocation5], %s3382_s21  ;;  %v2439_v24 = vld [vmem:[#allocation8 + $0xe0] sm:$0xf0] }
  0x6d   : > { %426 = vst [vmem:[#allocation2 + $0x1c] sm:$0x1] %v425_v45  ;;  %v469_v60 = vld [vmem:[%s468_s14] sm:$0x1]  ;;  %p475_p7 = scmp.gt.s32.totalorder %s3134_s23, 0  ;;  %p1884_p8 = scmp.lt.s32.totalorder %s3134_s23, 255  ;;  %v2070_v25 = vor.u32 %v2439_v24, %v2069_v22 }
  0x6e   : > { %427 = vst [vmem:[#allocation2 + $0x23] sm:$0x1] %v425_v45  ;;  %s3145_s16 = sld [smem:[#allocation4 + %s484_s8]]  ;;  %s495_s19 = sadd.s32 19, %s2948_s1  ;;  %v2444_v26 = vld [vmem:[#allocation8 + $0x10c] sm:$0xf] }
  0x6f   : > { %461 = vst [vmem:[#allocation2 + $0x2d] sm:$0x1] %v458_v55  ;;  %s3384_s23 = smov (!%p475_p7, %s3134_s23), 0  ;;  %s3158_s24 = sld [smem:[#allocation4 + %s495_s19]]  ;;  %v2095_v27 = vld [vmem:[#allocation8 + $0x114] sm:$0xf0]  ;;  %1207 = vmatpush.bf16.xpose.msra.mxu3 %v2070_v25 }
  0x70   : > { %1220 = vmatpush.bf16.xpose.msrb.mxu0 %v2146_v31  ;;  %1239 = vmatpush.bf16.xpose.msrb.mxu1 %v2150_v33  ;;  %437 = vst [vmem:[#allocation2 + $0x1d] sm:$0x1] %v436_v49  ;;  %p291_p9 = scmp.gt.s32.totalorder %s3138_s7, 0  ;;  %p1799_p10 = scmp.lt.s32.totalorder %s3138_s7, 255  ;;  %v2098_v29 = vor.u32 %v2444_v26, %v2095_v27  ;;  %v2101_v30 = vld [vmem:[#allocation8 + $0x110] sm:$0xf] }
  0x71   : > { %438 = vst [vmem:[#allocation2 + $0x24] sm:$0x1] %v436_v49  ;;  %s3386_s23 = smov (!%p1884_p8, %s3384_s23), 255  ;;  %s506_s12 = sadd.s32 20, %s2948_s1  ;;  %v2446_v31 = vld [vmem:[#allocation8 + $0x118] sm:$0xf0] }
  0x72   : > { %448 = vst [vmem:[#allocation2 + $0x1e] sm:$0x1] %v447_v52  ;;  %s3388_s7 = smov (!%p291_p9, %s3138_s7), 0  ;;  %p300_p11 = scmp.gt.s32.totalorder %s3141_s13, 0  ;;  %v2102_v32 = vor.u32 %v2446_v31, %v2101_v30  ;;  %v2237_v33 = vld [vmem:[#allocation8 + $0x228] sm:$0xf] }
  0x73   : > { %472 = vst [vmem:[#allocation2 + $0x2e] sm:$0x1] %v469_v60  ;;  %s479_s20 = scalar_lea.vmem [#allocation5], %s3386_s23  ;;  %s3390_s7 = smov (!%p1799_p10, %s3388_s7), 255  ;;  %v2481_v35 = vld [vmem:[#allocation8 + $0x230] sm:$0xf0] }
  0x74   : > { %449 = vst [vmem:[#allocation2 + $0x25] sm:$0x1] %v447_v52  ;;  %v480_v2 = vld [vmem:[%s479_s20] sm:$0x1]  ;;  %s301_s15 = scalar_select %p300_p11, %s3141_s13, 0  ;;  %v2238_v37 = vor.u32 %v2481_v35, %v2237_v33 }
  0x75   : > { %459 = vst [vmem:[#allocation2 + $0x1f] sm:$0x1] %v458_v55  ;;  %p1804_p12 = scmp.lt.s32.totalorder %s3141_s13, 255  ;;  %s295_s17 = scalar_lea.vmem [#allocation5], %s3390_s7  ;;  %v2057_v36 = vld [vmem:[#allocation8 + $0xc0] sm:$0xf] }
  0x76   : > { %460 = vst [vmem:[#allocation2 + $0x26] sm:$0x1] %v458_v55  ;;  %v296_v3 = vld [vmem:[%s295_s17] sm:$0x1]  ;;  %p486_p13 = scmp.gt.s32.totalorder %s3145_s16, 0  ;;  %p1889_p0 = scmp.lt.s32.totalorder %s3145_s16, 255  ;;  %1258 = vmatpush.bf16.xpose.msrb.mxu2 %v2238_v37 }
  0x77   : > { %470 = vst [vmem:[#allocation2 + $0x30] sm:$0x1] %v469_v60  ;;  %s3392_s15 = smov (!%p1804_p12, %s301_s15), 255  ;;  %s517_s18 = sadd.s32 21, %s2948_s1  ;;  %v2436_v38 = vld [vmem:[#allocation8 + $0xc8] sm:$0xf0] }
  0x78   : > { %1221 = vmatpush.bf16.xpose.msrb.mxu0 %v2134_v41  ;;  %1240 = vmatpush.bf16.xpose.msrb.mxu1 %v2138_v42  ;;  %471 = vst [vmem:[#allocation2 + $0x27] sm:$0x1] %v469_v60  ;;  %s3394_s16 = smov (!%p486_p13, %s3145_s16), 0  ;;  %s304_s2 = scalar_lea.vmem [#allocation5], %s3392_s15  ;;  %v2441_v39 = vld [vmem:[#allocation8 + $0xf4] sm:$0xf]  ;;  %v2058_v40 = vor.u32 %v2436_v38, %v2057_v36 }
  0x79   : > { %483 = vst [vmem:[#allocation2 + $0x2f] sm:$0x1] %v480_v2  ;;  %v305_v5 = vld [vmem:[%s304_s2] sm:$0x1]  ;;  %s3396_s16 = smov (!%p1889_p0, %s3394_s16), 255  ;;  %s3164_s21 = sld [smem:[#allocation4 + %s506_s12]] }
  0x7a   : > { %481 = vst [vmem:[#allocation2 + $0x31] sm:$0x1] %v480_v2  ;;  %s490_s22 = scalar_lea.vmem [#allocation5], %s3396_s16  ;;  %s3166_s23 = sld [smem:[#allocation4 + %s517_s18]]  ;;  %v2083_v41 = vld [vmem:[#allocation8 + $0xfc] sm:$0xf0]  ;;  %1208 = vmatpush.bf16.xpose.msra.mxu3 %v2058_v40 }
  0x7b   : > { %482 = vst [vmem:[#allocation2 + $0x38] sm:$0x1] %v480_v2  ;;  %v491_v8 = vld [vmem:[%s490_s22] sm:$0x1]  ;;  %s528_s29 = sadd.s32 22, %s2948_s1  ;;  %s539_s8 = sadd.s32 23, %s2948_s1  ;;  %v2086_v42 = vor.u32 %v2441_v39, %v2083_v41 }
  0x7c   : > { %297 = vst [vmem:[#allocation2] sm:$0x1] %v296_v3  ;;  %s3170_s7 = sld [smem:[#allocation4 + %s528_s29]]  ;;  %p497_p1 = scmp.gt.s32.totalorder %s3158_s24, 0  ;;  %v641_v9 = vld [vmem:[#allocation2 + $0x18] sm:$0xff] }
  0x7d   : > { %306 = vst [vmem:[#allocation2 + $0x1] sm:$0x1] %v305_v5  ;;  %p1894_p2 = scmp.lt.s32.totalorder %s3158_s24, 255  ;;  %s3175_s13 = sld [smem:[#allocation4 + %s539_s8]]  ;;  %v2480_v43 = vld [vmem:[#allocation8 + $0x22c] sm:$0xf] }
  0x7e   : > { %307 = vst [vmem:[#allocation2 + $0x8] sm:$0x1] %v305_v5  ;;  %s550_s14 = sadd.s32 24, %s2948_s1  ;;  %s3398_s24 = smov (!%p497_p1, %s3158_s24), 0  ;;  %v2239_v44 = vld [vmem:[#allocation8 + $0x234] sm:$0xf0] }
  0x7f   : > { %494 = vst [vmem:[#allocation2 + $0x40] sm:$0x1] %v491_v8  ;;  %v642_v10 = vld [vmem:[#allocation2 + $0x20] sm:$0xff]  ;;  %p508_p3 = scmp.gt.s32.totalorder %s3164_s21, 0  ;;  %p1899_p4 = scmp.lt.s32.totalorder %s3164_s21, 255  ;;  %v2242_v45 = vor.u32 %v2480_v43, %v2239_v44 }
  0x80   : > { %1222 = vmatpush.bf16.xpose.msrb.mxu0 %v2122_v50  ;;  %1241 = vmatpush.bf16.xpose.msrb.mxu1 %v2126_v54  ;;  %v643_v6 = vld [vmem:[#allocation2 + $0x28] sm:$0xff]  ;;  %492 = vst [vmem:[#allocation2 + $0x32] sm:$0x1] %v491_v8  ;;  %s3400_s24 = smov (!%p1894_p2, %s3398_s24), 255  ;;  %p519_p7 = scmp.gt.s32.totalorder %s3166_s23, 0 }
  0x81   : > { %v3162_v7 = vpack.c.bf16 %v643_v6, %v640_v4  ;;  %493 = vst [vmem:[#allocation2 + $0x39] sm:$0x1] %v491_v8  ;;  %s3402_s21 = smov (!%p508_p3, %s3164_s21), 0  ;;  %s501_s16 = scalar_lea.vmem [#allocation5], %s3400_s24  ;;  %v2089_v46 = vld [vmem:[#allocation8 + $0xf8] sm:$0xf] }
  0x82   : > { %v502_v15 = vld [vmem:[%s501_s16] sm:$0x1]  ;;  %s3404_s21 = smov (!%p1899_p4, %s3402_s21), 255  ;;  %p1904_p8 = scmp.lt.s32.totalorder %s3166_s23, 255  ;;  %v2443_v47 = vld [vmem:[#allocation8 + $0x100] sm:$0xf0]  ;;  %1277 = vmatpush.bf16.xpose.msrb.mxu3 %v2242_v45 }
  0x83   : > { %1190 = vmatmul.bf16.vlgmr.msra.gmra.mxu2 %v3162_v7  ;;  %505 = vst [vmem:[#allocation2 + $0x41] sm:$0x1] %v502_v15  ;;  %s520_s19 = scalar_select %p519_p7, %s3166_s23, 0  ;;  %v2090_v48 = vor.u32 %v2443_v47, %v2089_v46  ;;  %v2225_v49 = vld [vmem:[#allocation8 + $0x210] sm:$0xf] }
  0x84   : > { %v638_v11 = vld [vmem:[#allocation2] sm:$0xff]  ;;  %503 = vst [vmem:[#allocation2 + $0x33] sm:$0x1] %v502_v15  ;;  %s512_s20 = scalar_lea.vmem [#allocation5], %s3404_s21  ;;  %p530_p9 = scmp.gt.s32.totalorder %s3170_s7, 0 }
  0x85   : > { %v3181_v12 = vpack.c.bf16 %v641_v9, %v638_v11  ;;  %v639_v13 = vld [vmem:[#allocation2 + $0x8] sm:$0xff]  ;;  %v513_v16 = vld [vmem:[%s512_s20] sm:$0x1]  ;;  %p1909_p10 = scmp.lt.s32.totalorder %s3170_s7, 255  ;;  %504 = vst [vmem:[#allocation2 + $0x3a] sm:$0x1] %v502_v15 }
  0x86   : > { %v3183_v14 = vpack.c.bf16 %v642_v10, %v639_v13  ;;  %516 = vst [vmem:[#allocation2 + $0x42] sm:$0x1] %v513_v16  ;;  %s3406_s19 = smov (!%p1904_p8, %s520_s19), 255  ;;  %s3408_s7 = smov (!%p530_p9, %s3170_s7), 0  ;;  %v2478_v50 = vld [vmem:[#allocation8 + $0x218] sm:$0xf0] }
  0x87   : > { %1152 = vmatmul.bf16.vlgmr.msra.gmra.mxu0 %v3181_v12  ;;  %514 = vst [vmem:[#allocation2 + $0x34] sm:$0x1] %v513_v16  ;;  %p541_p11 = scmp.gt.s32.totalorder %s3175_s13, 0  ;;  %s523_s15 = scalar_lea.vmem [#allocation5], %s3406_s19  ;;  %v2438_v51 = vld [vmem:[#allocation8 + $0xdc] sm:$0xf]  ;;  %v2226_v53 = vor.u32 %v2478_v50, %v2225_v49  ;;  %1209 = vmatmul.bf16.vlgmr.msra.gmra.mxu3 %v3181_v12 }
  0x88   : > { %1223 = vmatpush.bf16.xpose.msrb.mxu0 %v2110_v62  ;;  %1242 = vmatpush.bf16.xpose.msrb.mxu1 %v2114_v1  ;;  %515 = vst [vmem:[#allocation2 + $0x3b] sm:$0x1] %v513_v16  ;;  %v524_v17 = vld [vmem:[%s523_s15] sm:$0x1]  ;;  %s3410_s7 = smov (!%p1909_p10, %s3408_s7), 255  ;;  %p1914_p12 = scmp.lt.s32.totalorder %s3175_s13, 255 }
  0x89   : > { %1171 = vmatmul.bf16.vlgmr.msra.gmra.mxu1 %v3183_v14  ;;  %527 = vst [vmem:[#allocation2 + $0x43] sm:$0x1] %v524_v17  ;;  %s542_s17 = scalar_select %p541_p11, %s3175_s13, 0  ;;  %v2071_v52 = vld [vmem:[#allocation8 + $0xe4] sm:$0xf0]  ;;  %1259 = vmatpush.bf16.xpose.msrb.mxu2 %v2226_v53 }
  0x8a   : > { %525 = vst [vmem:[#allocation2 + $0x35] sm:$0x1] %v524_v17  ;;  %s534_s24 = scalar_lea.vmem [#allocation5], %s3410_s7  ;;  %s551_s2 = sld [smem:[#allocation4 + %s550_s14]]  ;;  %v2477_v54 = vld [vmem:[#allocation8 + $0x214] sm:$0xf]  ;;  %v2074_v58 = vor.u32 %v2438_v51, %v2071_v52 }
  0x8b   : > { %v535_v18 = vld [vmem:[%s534_s24] sm:$0x1]  ;;  %s561_s12 = sadd.s32 25, %s2948_s1  ;;  %526 = vst [vmem:[#allocation2 + $0x3c] sm:$0x1] %v524_v17  ;;  %s3412_s17 = smov (!%p1914_p12, %s542_s17), 255 }
  0x8c   : > { %538 = vst [vmem:[#allocation2 + $0x44] sm:$0x1] %v535_v18  ;;  %s562_s18 = sld [smem:[#allocation4 + %s561_s12]]  ;;  %s572_s21 = sadd.s32 26, %s2948_s1  ;;  %v2227_v55 = vld [vmem:[#allocation8 + $0x21c] sm:$0xf0] }
  0x8d   : > { %536 = vst [vmem:[#allocation2 + $0x36] sm:$0x1] %v535_v18  ;;  %s3201_s22 = sld [smem:[#allocation4 + %s572_s21]]  ;;  %s545_s23 = scalar_lea.vmem [#allocation5], %s3412_s17  ;;  %v2077_v57 = vld [vmem:[#allocation8 + $0xe0] sm:$0xf]  ;;  %v2230_v59 = vor.u32 %v2477_v54, %v2227_v55 }
  0x8e   : > { %537 = vst [vmem:[#allocation2 + $0x3d] sm:$0x1] %v535_v18  ;;  %v546_v19 = vld [vmem:[%s545_s23] sm:$0x1]  ;;  %s583_s29 = sadd.s32 27, %s2948_s1  ;;  %s594_s7 = sadd.s32 28, %s2948_s1 }
  0x8f   : > { %549 = vst [vmem:[#allocation2 + $0x45] sm:$0x1] %v546_v19  ;;  %s3205_s8 = sld [smem:[#allocation4 + %s583_s29]]  ;;  %s605_s13 = sadd.s32 29, %s2948_s1  ;;  %v2440_v60 = vld [vmem:[#allocation8 + $0xe8] sm:$0xf0]  ;;  %1278 = vmatpush.bf16.xpose.msrb.mxu3 %v2230_v59 }
  0x90   : > { %p552_p13 = scmp.gt.s32.totalorder %s551_s2, 0  ;;  %p1919_p0 = scmp.lt.s32.totalorder %s551_s2, 255  ;;  %547 = vst [vmem:[#allocation2 + $0x37] sm:$0x1] %v546_v19  ;;  %1224 = vmatpush.bf16.xpose.msrb.mxu0 %v2098_v29  ;;  %1243 = vmatpush.bf16.xpose.msrb.mxu1 %v2102_v32  ;;  %v2213_v61 = vld [vmem:[#allocation8 + $0x1f8] sm:$0xf]  ;;  %v2078_v0 = vor.u32 %v2440_v60, %v2077_v57 }
  0x91   : > { %s3208_s14 = sld [smem:[#allocation4 + %s594_s7]]  ;;  %s616_s16 = sadd.s32 30, %s2948_s1  ;;  %548 = vst [vmem:[#allocation2 + $0x3e] sm:$0x1] %v546_v19  ;;  %v2475_v63 = vld [vmem:[#allocation8 + $0x200] sm:$0xf0] }
  0x92   : > { %s3414_s2 = smov (!%p552_p13, %s551_s2), 0  ;;  %p563_p1 = scmp.gt.s32.totalorder %s562_s18, 0  ;;  %v2435_v1 = vld [vmem:[#allocation8 + $0xc4] sm:$0xf]  ;;  %v2059_v2 = vld [vmem:[#allocation8 + $0xcc] sm:$0xf0]  ;;  %v2214_v4 = vor.u32 %v2475_v63, %v2213_v61 }
  0x93   : > { %p1924_p2 = scmp.lt.s32.totalorder %s562_s18, 255  ;;  %s3416_s2 = smov (!%p1919_p0, %s3414_s2), 255  ;;  %v2474_v3 = vld [vmem:[#allocation8 + $0x1fc] sm:$0xf]  ;;  %v2215_v5 = vld [vmem:[#allocation8 + $0x204] sm:$0xf0]  ;;  %v2062_v10 = vor.u32 %v2435_v1, %v2059_v2 }
  0x94   : > { %s3418_s18 = smov (!%p563_p1, %s562_s18), 0  ;;  %p574_p3 = scmp.gt.s32.totalorder %s3201_s22, 0  ;;  %v2245_v8 = vld [vmem:[#allocation8 + $0x230] sm:$0xf]  ;;  %v2482_v9 = vld [vmem:[#allocation8 + $0x238] sm:$0xf0]  ;;  %v2218_v11 = vor.u32 %v2474_v3, %v2215_v5  ;;  %1260 = vmatpush.bf16.xpose.msrb.mxu2 %v2214_v4 }
  0x95   : > { %s556_s19 = scalar_lea.vmem [#allocation5], %s3416_s2  ;;  %s3420_s18 = smov (!%p1924_p2, %s3418_s18), 255  ;;  %v2065_v13 = vld [vmem:[#allocation8 + $0xc8] sm:$0xf]  ;;  %v2437_v15 = vld [vmem:[#allocation8 + $0xd0] sm:$0xf0]  ;;  %v2246_v16 = vor.u32 %v2482_v9, %v2245_v8 }
  0x96   : > { %v557_v20 = vld [vmem:[%s556_s19] sm:$0x1]  ;;  %s575_s20 = scalar_select %p574_p3, %s3201_s22, 0  ;;  %v2066_v17 = vor.u32 %v2437_v15, %v2065_v13  ;;  %v2472_v19 = vld [vmem:[#allocation8 + $0x1e8] sm:$0xf0] }
  0x97   : > { %560 = vst [vmem:[#allocation2 + $0x46] sm:$0x1] %v557_v20  ;;  %p1929_p4 = scmp.lt.s32.totalorder %s3201_s22, 255  ;;  %s567_s15 = scalar_lea.vmem [#allocation5], %s3420_s18  ;;  %v2201_v18 = vld [vmem:[#allocation8 + $0x1e0] sm:$0xf]  ;;  %1279 = vmatpush.bf16.xpose.msrb.mxu3 %v2218_v11 }
  0x98   : > { %558 = vst [vmem:[#allocation2 + $0x48] sm:$0x1] %v557_v20  ;;  %v568_v21 = vld [vmem:[%s567_s15] sm:$0x1]  ;;  %p585_p7 = scmp.gt.s32.totalorder %s3205_s8, 0  ;;  %p1934_p8 = scmp.lt.s32.totalorder %s3205_s8, 255  ;;  %1225 = vmatpush.bf16.xpose.msrb.mxu0 %v2086_v42  ;;  %1244 = vmatpush.bf16.xpose.msrb.mxu1 %v2090_v48  ;;  %v2202_v26 = vor.u32 %v2472_v19, %v2201_v18 }
  0x99   : > { %559 = vst [vmem:[#allocation2 + $0x3f] sm:$0x1] %v557_v20  ;;  %s3422_s20 = smov (!%p1929_p4, %s575_s20), 255  ;;  %p596_p9 = scmp.gt.s32.totalorder %s3208_s14, 0  ;;  %v2203_v24 = vld [vmem:[#allocation8 + $0x1ec] sm:$0xf0] }
  0x9a   : > { %571 = vst [vmem:[#allocation2 + $0x47] sm:$0x1] %v568_v21  ;;  %s3424_s8 = smov (!%p585_p7, %s3205_s8), 0  ;;  %s578_s17 = scalar_lea.vmem [#allocation5], %s3422_s20  ;;  %v2233_v27 = vld [vmem:[#allocation8 + $0x218] sm:$0xf] }
  0x9b   : > { %569 = vst [vmem:[#allocation2 + $0x49] sm:$0x1] %v568_v21  ;;  %v579_v23 = vld [vmem:[%s578_s17] sm:$0x1]  ;;  %s3426_s8 = smov (!%p1934_p8, %s3424_s8), 255  ;;  %p1939_p10 = scmp.lt.s32.totalorder %s3208_s14, 255 }
  0x9c   : > { %570 = vst [vmem:[#allocation2 + $0x50] sm:$0x1] %v568_v21  ;;  %s597_s24 = scalar_select %p596_p9, %s3208_s14, 0  ;;  %v644_v21 = vld [vmem:[#allocation2 + $0x30] sm:$0xff]  ;;  %1261 = vmatpush.bf16.xpose.msrb.mxu2 %v2202_v26  ;;  %v2189_v36 = vld [vmem:[#allocation8 + $0x1c8] sm:$0xf] }
  0x9d   : > { %582 = vst [vmem:[#allocation2 + $0x58] sm:$0x1] %v579_v23  ;;  %s589_s2 = scalar_lea.vmem [#allocation5], %s3426_s8  ;;  %s3222_s12 = sld [smem:[#allocation4 + %s605_s13]]  ;;  %v2469_v37 = vld [vmem:[#allocation8 + $0x1d0] sm:$0xf0] }
  0x9e   : > { %580 = vst [vmem:[#allocation2 + $0x4a] sm:$0x1] %v579_v23  ;;  %v590_v28 = vld [vmem:[%s589_s2] sm:$0x1]  ;;  %s627_s18 = sadd.s32 31, %s2948_s1  ;;  %s3428_s24 = smov (!%p1939_p10, %s597_s24), 255  ;;  %v2190_v40 = vor.u32 %v2469_v37, %v2189_v36 }
  0x9f   : > { %581 = vst [vmem:[#allocation2 + $0x51] sm:$0x1] %v579_v23  ;;  %s3227_s21 = sld [smem:[#allocation4 + %s616_s16]]  ;;  %s600_s23 = scalar_lea.vmem [#allocation5], %s3428_s24  ;;  %v2471_v23 = vld [vmem:[#allocation8 + $0x1e4] sm:$0xf] }
  0xa0   : > { %593 = vst [vmem:[#allocation2 + $0x59] sm:$0x1] %v590_v28  ;;  %s3229_s22 = sld [smem:[#allocation4 + %s627_s18]]  ;;  %v601_v34 = vld [vmem:[%s600_s23] sm:$0x1]  ;;  %1226 = vmatpush.bf16.xpose.msrb.mxu0 %v2074_v58  ;;  %1245 = vmatpush.bf16.xpose.msrb.mxu1 %v2078_v0  ;;  %v645_v22 = vld [vmem:[#allocation2 + $0x38] sm:$0xff]  ;;  %v2206_v33 = vor.u32 %v2471_v23, %v2203_v24 }
  0xa1   : > { %591 = vst [vmem:[#allocation2 + $0x4b] sm:$0x1] %v590_v28  ;;  %v646_v20 = vld [vmem:[#allocation2 + $0x40] sm:$0xff]  ;;  %v2468_v38 = vld [vmem:[#allocation8 + $0x1cc] sm:$0xf]  ;;  %s274_s16 = sand.u32 1, %s2794_s26  }
  0xa2   : > { %592 = vst [vmem:[#allocation2 + $0x52] sm:$0x1] %v590_v28  ;;  %v2479_v28 = vld [vmem:[#allocation8 + $0x220] sm:$0xf0]  ;;  %1280 = vmatpush.bf16.xpose.msrb.mxu3 %v2206_v33  ;;  %v2191_v39 = vld [vmem:[#allocation8 + $0x1d4] sm:$0xf0] }
  0xa3   : > { %604 = vst [vmem:[#allocation2 + $0x5a] sm:$0x1] %v601_v34  ;;  %p607_p11 = scmp.gt.s32.totalorder %s3222_s12, 0  ;;  %p1944_p12 = scmp.lt.s32.totalorder %s3222_s12, 255  ;;  %v2234_v35 = vor.u32 %v2479_v28, %v2233_v27  ;;  %v2221_v41 = vld [vmem:[#allocation8 + $0x200] sm:$0xf]  ;;  %v2194_v43 = vor.u32 %v2468_v38, %v2191_v39 }
  0xa4   : > { %602 = vst [vmem:[#allocation2 + $0x4c] sm:$0x1] %v601_v34  ;;  %v2476_v42 = vld [vmem:[#allocation8 + $0x208] sm:$0xf0]  ;;  %1262 = vmatpush.bf16.xpose.msrb.mxu2 %v2190_v40  ;;  %v2177_v45 = vld [vmem:[#allocation8 + $0x1b0] sm:$0xf] }
  0xa5   : > { %603 = vst [vmem:[#allocation2 + $0x53] sm:$0x1] %v601_v34  ;;  %s608_s1 = scalar_select %p607_p11, %s3222_s12, 0  ;;  %v2222_v44 = vor.u32 %v2476_v42, %v2221_v41  ;;  %v2466_v46 = vld [vmem:[#allocation8 + $0x1b8] sm:$0xf0] }
  0xa6   : > { %p618_p13 = scmp.gt.s32.totalorder %s3227_s21, 0  ;;  %p1949_p0 = scmp.lt.s32.totalorder %s3227_s21, 255  ;;  %v2465_v47 = vld [vmem:[#allocation8 + $0x1b4] sm:$0xf]  ;;  %v2179_v48 = vld [vmem:[#allocation8 + $0x1bc] sm:$0xf0]  ;;  %v2178_v49 = vor.u32 %v2466_v46, %v2177_v45 }
  0xa7   : > { %s3430_s1 = smov (!%p1944_p12, %s608_s1), 255  ;;  %p629_p1 = scmp.gt.s32.totalorder %s3229_s22, 0  ;;  %v2209_v50 = vld [vmem:[#allocation8 + $0x1e8] sm:$0xf]  ;;  %v2473_v51 = vld [vmem:[#allocation8 + $0x1f0] sm:$0xf0]  ;;  %v2182_v52 = vor.u32 %v2465_v47, %v2179_v48 }
  0xa8   : > { %s619_s29 = scalar_select %p618_p13, %s3227_s21, 0  ;;  %1227 = vmatpush.bf16.xpose.msrb.mxu0 %v2062_v10  ;;  %1246 = vmatpush.bf16.xpose.msrb.mxu1 %v2066_v17  ;;  %v2210_v53 = vor.u32 %v2473_v51, %v2209_v50  ;;  %v2165_v54 = vld [vmem:[#allocation8 + $0x198] sm:$0xf]  ;;  %v2463_v55 = vld [vmem:[#allocation8 + $0x1a0] sm:$0xf0] }
  0xa9   : > { %s611_s7 = scalar_lea.vmem [#allocation5], %s3430_s1  ;;  %p1954_p2 = scmp.lt.s32.totalorder %s3229_s22, 255  ;;  %v2167_v57 = vld [vmem:[#allocation8 + $0x1a4] sm:$0xf0]  ;;  %v2166_v58 = vor.u32 %v2463_v55, %v2165_v54  ;;  %v2197_v59 = vld [vmem:[#allocation8 + $0x1d0] sm:$0xf] }
  0xaa   : > { %v612_v56 = vld [vmem:[%s611_s7] sm:$0x1]  ;;  %s3432_s29 = smov (!%p1949_p0, %s619_s29), 255  ;;  %1281 = vmatpush.bf16.xpose.msrb.mxu3 %v2194_v43  ;;  %v2470_v60 = vld [vmem:[#allocation8 + $0x1d8] sm:$0xf0]  ;;  %s2344_s19 = sshll.u32 %s2873_s0, 1 }
  0xab   : > { %615 = vst [vmem:[#allocation2 + $0x5b] sm:$0x1] %v612_v56  ;;  %s630_s8 = scalar_select %p629_p1, %s3229_s22, 0  ;;  %v2153_v63 = vld [vmem:[#allocation8 + $0x180] sm:$0xf] }
  0xac   : > { %613 = vst [vmem:[#allocation2 + $0x4d] sm:$0x1] %v612_v56  ;;  %s622_s13 = scalar_lea.vmem [#allocation5], %s3432_s29  ;;  %1263 = vmatpush.bf16.xpose.msrb.mxu2 %v2178_v49  ;;  %v2460_v0 = vld [vmem:[#allocation8 + $0x188] sm:$0xf0]  ;;  %s1797_s17 = sshll.u32 %s274_s16, 1 }
  0xad   : > { %v623_v62 = vld [vmem:[%s622_s13] sm:$0x1]  ;;  %614 = vst [vmem:[#allocation2 + $0x54] sm:$0x1] %v612_v56  ;;  %s3434_s8 = smov (!%p1954_p2, %s630_s8), 255  ;;  %s1661_s12 = scalar_lea.hbm %s3332_s6, %s2344_s19 }
  0xae   : > { %626 = vst [vmem:[#allocation2 + $0x5c] sm:$0x1] %v623_v62  ;;  %s633_s14 = scalar_lea.vmem [#allocation5], %s3434_s8  ;;  %v2462_v56 = vld [vmem:[#allocation8 + $0x19c] sm:$0xf]  ;;  %s276_s18 = scalar_lea.vmem [#allocation13], %s1797_s17 }
  0xaf   : > { %624 = vst [vmem:[#allocation2 + $0x4e] sm:$0x1] %v623_v62  ;;  %v634_v6 = vld [vmem:[%s633_s14] sm:$0x1]  ;;  %v2170_v61 = vor.u32 %v2462_v56, %v2167_v57  ;;  %v2333_v1 = vld [vmem:[#allocation11 + $0xa8] sm:$0xf] }
  0xb0   : > { %625 = vst [vmem:[#allocation2 + $0x55] sm:$0x1] %v623_v62  ;;  %1296 = vmatpush.bf16.xpose.msra.mxu0 %v2246_v16  ;;  %v2198_v62 = vor.u32 %v2470_v60, %v2197_v59  ;;  %v2505_v2 = vld [vmem:[#allocation11 + $0xb0] sm:$0xf0]  ;;  %v2459_v3 = vld [vmem:[#allocation8 + $0x184] sm:$0xf] }
  0xb1   : > { %637 = vst [vmem:[#allocation2 + $0x5d] sm:$0x1] %v634_v6  ;;  %v2155_v4 = vld [vmem:[#allocation8 + $0x18c] sm:$0xf0]  ;;  %v2334_v5 = vor.u32 %v2505_v2, %v2333_v1  ;;  %v2185_v8 = vld [vmem:[#allocation8 + $0x1b8] sm:$0xf] }
  0xb2   : > { %635 = vst [vmem:[#allocation2 + $0x4f] sm:$0x1] %v634_v6  ;;  %1282 = vmatpush.bf16.xpose.msrb.mxu3 %v2182_v52  ;;  %v2467_v9 = vld [vmem:[#allocation8 + $0x1c0] sm:$0xf0]  ;;  %v2158_v10 = vor.u32 %v2459_v3, %v2155_v4  ;;  %v2173_v13 = vld [vmem:[#allocation8 + $0x1a0] sm:$0xf] }
  0xb3   : > { %636 = vst [vmem:[#allocation2 + $0x56] sm:$0x1] %v634_v6  ;;  %v2154_v6 = vor.u32 %v2460_v0, %v2153_v63  ;;  %1610 = vmatpush.bf16.xpose.msra.mxu1 %v2334_v5  ;;  %v2186_v11 = vor.u32 %v2467_v9, %v2185_v8  ;;  %v2464_v15 = vld [vmem:[#allocation8 + $0x1a8] sm:$0xf0]  ;;  %v2321_v17 = vld [vmem:[#allocation11 + $0x90] sm:$0xf] }
  0xb4   : > { %1264 = vmatpush.bf16.xpose.msrb.mxu2 %v2166_v58  ;;  %v2174_v16 = vor.u32 %v2464_v15, %v2173_v13  ;;  %v2502_v18 = vld [vmem:[#allocation11 + $0x98] sm:$0xf0]  ;;  %v2499_v23 = vld [vmem:[#allocation11 + $0x80] sm:$0xf0]  ;;  %v2285_v28 = vld [vmem:[#allocation11 + $0x48] sm:$0xf] }
  0xb5   : > { %v2322_v19 = vor.u32 %v2502_v18, %v2321_v17  ;;  %v3265_v33 = vld [vmem:[#allocation10] sm:$0x7]  ;;  %v2504_v41 = vld [vmem:[#allocation11 + $0xac] sm:$0xf]  ;;  %v2261_v46 = vld [vmem:[#allocation11 + $0x18] sm:$0xf] }
  0xb6   : > { %v2490_v37 = vld [vmem:[#allocation11 + $0x38] sm:$0xf0]  ;;  %v2487_v47 = vld [vmem:[#allocation11 + $0x20] sm:$0xf0]  ;;  %v2501_v52 = vld [vmem:[#allocation11 + $0x94] sm:$0xf] }
  0xb7   : > { %v2262_v48 = vor.u32 %v2487_v47, %v2261_v46  ;;  %v2249_v57 = vld [vmem:[#allocation11] sm:$0xf]  ;;  %v2484_v58 = vld [vmem:[#allocation11 + $0x8] sm:$0xf0]  ;;  %v2498_v63 = vld [vmem:[#allocation11 + $0x7c] sm:$0xf] }
  0xb8   : > { %v649_v25 = vld [vmem:[#allocation2 + $0x58] sm:$0xff]  ;;  %1297 = vmatpush.bf16.xpose.msra.mxu0 %v2234_v35  ;;  %v2250_v59 = vor.u32 %v2484_v58, %v2249_v57  ;;  %v2311_v0 = vld [vmem:[#allocation11 + $0x84] sm:$0xf0]  ;;  %v2495_v13 = vld [vmem:[#allocation11 + $0x64] sm:$0xf]  ;;  %s1663_s21 = sshll.u32 %s276_s18, 4  ;;  %s1664_s21 = int_to_ptr.vmem [resolvable:$true] %s1663_s21 }
  0xb9   : > { %v3245_v29 = vpack.c.bf16 %v649_v25, %v646_v20  ;;  %v647_v30 = vld [vmem:[#allocation2 + $0x48] sm:$0xff]  ;;  %v2314_v2 = vor.u32 %v2498_v63, %v2311_v0  ;;  %v2299_v15 = vld [vmem:[#allocation11 + $0x6c] sm:$0xf0]  ;;  %v2489_v47 = vld [vmem:[#allocation11 + $0x34] sm:$0xf]  ;;  %s1665_s22 = sshll.u32 %s1661_s12, 4  ;;  %s1666_s22 = int_to_ptr.hbm [resolvable:$true] %s1665_s22 }
  0xba   : > { %v3247_v31 = vpack.c.bf16 %v647_v30, %v644_v21  ;;  %v648_v32 = vld [vmem:[#allocation2 + $0x50] sm:$0xff]  ;;  %1283 = vmatpush.bf16.xpose.msrb.mxu3 %v2170_v61  ;;  %v2161_v20 = vld [vmem:[#allocation8 + $0x188] sm:$0xf]  ;;  %v2493_v30 = vld [vmem:[#allocation11 + $0x50] sm:$0xf0]  ;;  %v2302_v17 = vor.u32 %v2495_v13, %v2299_v15  ;;  %s1651_s0 = scalar_lea.sflag [#allocation7], %s274_s16 }
  0xbb   : > { %1195 = vmatmul.bf16.gmra.mxu2 %v3245_v29  ;;  %v3250_v34 = vpack.c.bf16 %v648_v32, %v645_v22  ;;  %v2461_v21 = vld [vmem:[#allocation8 + $0x190] sm:$0xf0]  ;;  %1611 = vmatpush.bf16.xpose.msra.mxu1 %v2322_v19  ;;  %v2309_v22 = vld [vmem:[#allocation11 + $0x78] sm:$0xf]  ;;  %v2286_v32 = vor.u32 %v2493_v30, %v2285_v28  ;;  %v2492_v28 = vld [vmem:[#allocation11 + $0x4c] sm:$0xf] }
  0xbc   : > { %1157 = vmatmul.bf16.gmra.mxu0 %v3247_v31  ;;  %1214 = vmatmul.bf16.gmra.mxu3 %v3247_v31  ;;  %v2162_v24 = vor.u32 %v2461_v21, %v2161_v20  ;;  %v2310_v25 = vor.u32 %v2499_v23, %v2309_v22  ;;  %v3269_v20 = vperm.slane %v3265_v33, 1  ;;  %v2287_v30 = vld [vmem:[#allocation11 + $0x54] sm:$0xf0]  ;;  %v2486_v63 = vld [vmem:[#allocation11 + $0x1c] sm:$0xf]  ;;  %s2740_s23 = sshra.s32 %s1666_s22, 4  ;;  %s2741_s23 = int_to_ptr.hbm [resolvable:$true] %s2740_s23 }
  0xbd   : > { %1176 = vmatmul.bf16.gmra.mxu1 %v3250_v34  ;;  %1265 = vmatpush.bf16.xpose.msrb.mxu2 %v2154_v6  ;;  %v2263_v0 = vld [vmem:[#allocation11 + $0x24] sm:$0xf0]  ;;  %v2483_v13 = vld [vmem:[#allocation11 + $0x4] sm:$0xf]  ;;  %s2742_s1 = scalar_lea.hbm %s2741_s23, 2  ;;  %s2746_s8 = scalar_lea.hbm %s3332_s6, 4 }
  0xbe   : > { %p2743_p3 = scmp.ne.s32.totalorder %s2741_s23, %s2742_s1  ;;  %p2747_p8 = scmp.lt.s32.totalorder %s2741_s23, %s3332_s6 }
  0xbf   : > { %p2748_p9 = scmp.lt.s32.totalorder %s2746_s8, %s2742_s1 }
  0xc0   : > { %1298 = vmatpush.bf16.xpose.msra.mxu0 %v2222_v44  ;;  %p2744_p4 = pnand %p2743_p3, %p2890_p5 }
  0xc1   : > { %p2749_p10 = por %p2748_p9, %p2747_p8 }
  0xc2   : > { %1284 = vmatpush.bf16.xpose.msrb.mxu3 %v2158_v10  ;;  %p2745_p7 = pneg %p2744_p4 }
  0xc3   : > { %1612 = vmatpush.bf16.xpose.msra.mxu1 %v2310_v25 }
  0xc4   : > { %p2750_p11 = pnand %p2749_p10, %p2745_p7 }
  0xc8   : > { %1299 = vmatpush.bf16.xpose.msra.mxu0 %v2210_v53  ;;  %v2323_v53 = vld [vmem:[#allocation11 + $0x9c] sm:$0xf0] }
  0xc9   : > { %v2326_v54 = vor.u32 %v2501_v52, %v2323_v53 }
  0xcb   : > { %1266 = vmatmul.bf16.vlgmr.msrb.gmra.mxu2 %v3181_v12  ;;  %v2297_v12 = vld [vmem:[#allocation11 + $0x60] sm:$0xf] }
  0xcc   : > { %1228 = vmatmul.bf16.vlgmr.msrb.gmra.mxu0 %v3183_v14  ;;  %1285 = vmatmul.bf16.vlgmr.msrb.gmra.mxu3 %v3183_v14  ;;  %v2496_v14 = vld [vmem:[#allocation11 + $0x68] sm:$0xf0] }
  0xcd   : > { %1247 = vmatmul.bf16.vlgmr.msrb.gmra.mxu1 %v3162_v7  ;;  %v2298_v26 = vor.u32 %v2496_v14, %v2297_v12 }
  0xcf   : > { %1613 = vmatpush.bf16.xpose.msra.mxu1 %v2298_v26 }
  0xd0   : > { %1300 = vmatpush.bf16.xpose.msra.mxu0 %v2198_v62 }
  0xd7   : > { %1614 = vmatpush.bf16.xpose.msra.mxu1 %v2286_v32 }
  0xd8   : > { %1301 = vmatpush.bf16.xpose.msra.mxu0 %v2186_v11 }
  0xdb   : > { %1271 = vmatmul.bf16.gmra.mxu2 %v3247_v31  ;;  %v754_v31 = vperm.slane %v3265_v33, 0 }
  0xdc   : > { %1233 = vmatmul.bf16.gmra.mxu0 %v3250_v34  ;;  %1290 = vmatmul.bf16.gmra.mxu3 %v3250_v34  ;;  %v2273_v34 = vld [vmem:[#allocation11 + $0x30] sm:$0xf] }
  0xdd   : > { %1252 = vmatmul.bf16.gmra.mxu1 %v3245_v29 }
  0xe0   : > { %1302 = vmatpush.bf16.xpose.msra.mxu0 %v2174_v16 }
  0xe8   : > { %1303 = vmatpush.bf16.xpose.msra.mxu0 %v2162_v24 }
  0xef   : > { %1304 = vmatmul.bf16.vlgmr.msra.gmra.mxu0 %v3162_v7  ;;  %v2274_v7 = vor.u32 %v2490_v37, %v2273_v34 }
  0xf1   : > { %1615 = vmatpush.bf16.xpose.msra.mxu1 %v2274_v7 }
  0xf9   : > { %1616 = vmatpush.bf16.xpose.msra.mxu1 %v2262_v48  ;;  %v2275_v48 = vld [vmem:[#allocation11 + $0x3c] sm:$0xf0] }
  0xff   : > { %1309 = vmatmul.bf16.gmra.mxu0 %v3245_v29  ;;  %v2335_v29 = vld [vmem:[#allocation11 + $0xb4] sm:$0xf0] }
 0x100   : > { %v2338_v42 = vor.u32 %v2504_v41, %v2335_v29 }
 0x101   : > { %1617 = vmatpush.bf16.xpose.msra.mxu1 %v2250_v59 }
 0x102   : > { %1623 = vmatpush.bf16.xpose.msra.mxu2 %v2338_v42 }
 0x104   : > { %v1153_v27 = vpop.f32.mrf.mxu0 }
 0x105   : > { %v1154_v39 = vadd.f32 %v1153_v27, %v754_v31  ;;  %v1327_v27 = vlaneseq }
 0x106   : > { %v1172_v35 = vpop.f32.mrf.mxu1  ;;  %v1191_v36 = vpop.f32.mrf.mxu2 }
 0x107   : > { %v1173_v44 = vadd.f32 %v1172_v35, %v1154_v39  ;;  %v2290_v35 = vor.u32 %v2492_v28, %v2287_v30  ;;  %v1328_v7 = vshrl.u32 %v1327_v27, 7 }
 0x109   : > { %v1192_v50 = vadd.f32 %v1191_v36, %v1173_v44 }
 0x10a   : > { %1624 = vmatpush.bf16.xpose.msra.mxu2 %v2326_v54  ;;  %v1210_v4 = vpop.f32.mrf.mxu3 }
 0x10b   : > { %v1315_v55 = vmax.f32 %v1192_v50, 0.0  ;;  %v1211_v14 = vadd.f32 %v1210_v4, %v3269_v20  ;;  %v2278_v50 = vor.u32 %v2489_v47, %v2275_v48  ;;  %v2506_v4 = vld [vmem:[#allocation11 + $0xb8] sm:$0xf0]  ;;  %v2497_v47 = vld [vmem:[#allocation11 + $0x70] sm:$0xf0] }
 0x10c   : > { %v1155_v38 = vpop.f32.mrf.mxu0 }
 0x10d   : > { %v1156_v40 = vadd.f32 %v1155_v38, %v754_v31 }
 0x10e   : > { %v1174_v43 = vpop.f32.mrf.mxu1  ;;  %v1193_v49 = vpop.f32.mrf.mxu2 }
 0x10f   : > { %v1175_v45 = vadd.f32 %v1174_v43, %v1156_v40  ;;  %v3273_v43 = vadd.s32 8, %v1328_v7 }
 0x111   : > { %v1194_v51 = vadd.f32 %v1193_v49, %v1175_v45  ;;  %vm1362_vm0 = vcmp.le.s32.totalorder %v3273_v43, 14  ;;  %vm1363_vm2 = vcmp.le.s32.totalorder %v3273_v43, 13 }
 0x112   : > { %1625 = vmatpush.bf16.xpose.msra.mxu2 %v2314_v2  ;;  %v1212_v24 = vpop.f32.mrf.mxu3  ;;  %v2266_v2 = vor.u32 %v2486_v63, %v2263_v0 }
 0x113   : > { %v1318_v56 = vmax.f32 %v1194_v51, 0.0  ;;  %v1213_v38 = vadd.f32 %v1212_v24, %v3269_v20 }
 0x115   : > { %v1376_v60 = vmax.f32 %v1315_v55, %v1318_v56 }
 0x117   : > { %v1377_v3 = vrot.slane %v1376_v60, 4 }
 0x119   : > { %v1378_v8 = vmax.f32 %v1376_v60, %v1377_v3  ;;  %v2341_v3 = vld [vmem:[#allocation11 + $0xb0] sm:$0xf] }
 0x11a   : > { %1626 = vmatpush.bf16.xpose.msra.mxu2 %v2302_v17  ;;  %v2251_v17 = vld [vmem:[#allocation11 + $0xc] sm:$0xf0] }
 0x11b   : > { %v1379_v19 = vrot.slane %v1378_v8, 2  ;;  %v2254_v24 = vor.u32 %v2483_v13, %v2251_v17  ;;  %v2491_v13 = vld [vmem:[#allocation11 + $0x40] sm:$0xf0] }
 0x11d   : > { %v1380_v25 = vmax.f32 %v1378_v8, %v1379_v19  ;;  %v2342_v8 = vor.u32 %v2506_v4, %v2341_v3  ;;  %v2503_v19 = vld [vmem:[#allocation11 + $0xa0] sm:$0xf0] }
 0x11f   : > { %v1381_v36 = vrot.slane %v1380_v25, 1  ;;  %1636 = vmatpush.bf16.xpose.msra.mxu3 %v2342_v8 }
 0x121   : > { %v1382_v40 = vmax.f32 %v1380_v25, %v1381_v36 }
 0x122   : > { %1627 = vmatpush.bf16.xpose.msra.mxu2 %v2290_v35  ;;  %v2317_v35 = vld [vmem:[#allocation11 + $0x80] sm:$0xf] }
 0x123   : > { %v1418_v52 = vpack.c.bf16 %v1382_v40, %v1382_v40 }
 0x125   : > { %v1466_v58 = vunpack.c.l.b16 %v1418_v52 }
 0x12a   : > { %1628 = vmatpush.bf16.xpose.msra.mxu2 %v2278_v50 }
 0x132   : > { %1629 = vmatpush.bf16.xpose.msra.mxu2 %v2266_v2 }
 0x139   : > { %v1158_v61 = vpop.f32.mrf.mxu0 }
 0x13a   : > { %v1177_v62 = vpop.f32.mrf.mxu1  ;;  %v1159_v1 = vadd.f32 %v1158_v61, %v754_v31  ;;  %1630 = vmatpush.bf16.xpose.msra.mxu2 %v2254_v24 }
 0x13c   : > { %v1178_v6 = vadd.f32 %v1177_v62, %v1159_v1 }
 0x13e   : > { %v1196_v5 = vpop.f32.mrf.mxu2 }
 0x13f   : > { %v1197_v16 = vadd.f32 %v1196_v5, %v1178_v6  ;;  %v1215_v44 = vpop.f32.mrf.mxu3 }
 0x140   : > { %v1216_v61 = vadd.f32 %v1215_v44, %v3269_v20 }
 0x141   : > { %v1160_v9 = vpop.f32.mrf.mxu0  ;;  %v1321_v22 = vmax.f32 %v1197_v16, 0.0 }
 0x142   : > { %v1161_v10 = vadd.f32 %v1160_v9, %v754_v31  ;;  %v1179_v11 = vpop.f32.mrf.mxu1 }
 0x144   : > { %v1180_v18 = vadd.f32 %v1179_v11, %v1161_v10 }
 0x146   : > { %v1198_v21 = vpop.f32.mrf.mxu2 }
 0x147   : > { %v1199_v23 = vadd.f32 %v1198_v21, %v1180_v18  ;;  %v1217_v6 = vpop.f32.mrf.mxu3  ;;  %v2329_v18 = vld [vmem:[#allocation11 + $0x98] sm:$0xf] }
 0x148   : > { %v1218_v16 = vadd.f32 %v1217_v6, %v3269_v20  ;;  %v2330_v25 = vor.u32 %v2503_v19, %v2329_v18  ;;  %v2500_v20 = vld [vmem:[#allocation11 + $0x88] sm:$0xf0] }
 0x149   : > { %v1324_v12 = vmax.f32 %v1199_v23, 0.0  ;;  %v1229_v26 = vpop.f32.mrf.mxu0  ;;  %v2318_v7 = vor.u32 %v2500_v20, %v2317_v35  ;;  %v2257_v20 = vld [vmem:[#allocation11 + $0x8] sm:$0xf] }
 0x14a   : > { %v1248_v32 = vpop.f32.mrf.mxu1  ;;  %v1230_v37 = vadd.f32 %v1229_v26, %v1211_v14  ;;  %1637 = vmatpush.bf16.xpose.msra.mxu3 %v2330_v25 }
 0x14b   : > { %v1397_v31 = vmax.f32 %v1321_v22, %v1324_v12 }
 0x14c   : > { %v1249_v29 = vadd.f32 %v1248_v32, %v1230_v37 }
 0x14d   : > { %v1398_v34 = vrot.slane %v1397_v31, 4 }
 0x14e   : > { %v1316_v54 = vmax.f32 %v1249_v29, 0.0  ;;  %v1267_v32 = vpop.f32.mrf.mxu2  ;;  %v756_v29 = vperm.slane %v3265_v33, 2 }
 0x14f   : > { %v1399_v39 = vmax.f32 %v1397_v31, %v1398_v34  ;;  %v1286_v37 = vpop.f32.mrf.mxu3 }
 0x150   : > { %v1268_v50 = vadd.f32 %v1267_v32, %v756_v29 }
 0x151   : > { %v1400_v41 = vrot.slane %v1399_v39, 2  ;;  %v1231_v42 = vpop.f32.mrf.mxu0 }
 0x152   : > { %v1232_v45 = vadd.f32 %v1231_v42, %v1213_v38  ;;  %v1250_v46 = vpop.f32.mrf.mxu1  ;;  %1638 = vmatpush.bf16.xpose.msra.mxu3 %v2318_v7 }
 0x153   : > { %v1401_v49 = vmax.f32 %v1399_v39, %v1400_v41 }
 0x154   : > { %v1251_v51 = vadd.f32 %v1250_v46, %v1232_v45  ;;  %v2305_v46 = vld [vmem:[#allocation11 + $0x68] sm:$0xf] }
 0x155   : > { %v1402_v53 = vrot.slane %v1401_v49, 1  ;;  %v2306_v48 = vor.u32 %v2497_v47, %v2305_v46 }
 0x156   : > { %v1319_v55 = vmax.f32 %v1251_v51, 0.0  ;;  %v1269_v42 = vpop.f32.mrf.mxu2 }
 0x157   : > { %v1403_v56 = vmax.f32 %v1401_v49, %v1402_v53  ;;  %v1288_v51 = vpop.f32.mrf.mxu3 }
 0x158   : > { %v1368_v57 = vsel %vm1362_vm0, %v1319_v55, 0.0  ;;  %v1270_v55 = vadd.f32 %v1269_v42, %v756_v29 }
 0x159   : > { %v1421_v59 = vpack.c.bf16 %v1403_v56, %v1403_v56  ;;  %v1383_v60 = vmax.f32 %v1316_v54, %v1368_v57  ;;  %v1234_v62 = vpop.f32.mrf.mxu0  ;;  %v2293_v56 = vld [vmem:[#allocation11 + $0x50] sm:$0xf]  ;;  %v2494_v57 = vld [vmem:[#allocation11 + $0x58] sm:$0xf0] }
 0x15a   : > { %v1253_v1 = vpop.f32.mrf.mxu1  ;;  %v1235_v11 = vadd.f32 %v1234_v62, %v1216_v61  ;;  %1639 = vmatpush.bf16.xpose.msra.mxu3 %v2306_v48  ;;  %v2294_v62 = vor.u32 %v2494_v57, %v2293_v56  ;;  %v1289_v63 = vadd.f32 %v1288_v51, %v1270_v55  ;;  %v2593_v56 = vld [vmem:[%s3331_s5] ss:$0 sm:$0xff] }
 0x15b   : > { %v1469_v5 = vunpack.c.l.b16 %v1421_v59  ;;  %v1384_v10 = vrot.slane %v1383_v60, 4  ;;  %v1287_v59 = vadd.f32 %v1286_v37, %v1268_v50 }
 0x15c   : > { %v1254_v22 = vadd.f32 %v1253_v1, %v1235_v11  ;;  %v2281_v11 = vld [vmem:[#allocation11 + $0x38] sm:$0xf] }
 0x15d   : > { %v1473_v9 = vsel %vm1472_vm1, %v1469_v5, %v1466_v58  ;;  %v1385_v21 = vmax.f32 %v1383_v60, %v1384_v10 }
 0x15e   : > { %v1476_v15 = vpack.c.b16 %v1473_v9, %v1473_v9  ;;  %v1322_v28 = vmax.f32 %v1254_v22, 0.0  ;;  %v1272_v61 = vpop.f32.mrf.mxu2  ;;  %v2269_v22 = vld [vmem:[#allocation11 + $0x20] sm:$0xf] }
 0x15f   : > { %v1386_v27 = vrot.slane %v1385_v21, 2  ;;  %v1291_v5 = vpop.f32.mrf.mxu3 }
 0x160   : > { %1618 = vmatmul.bf16.vlgmr.msra.gmra.mxu1 %v1476_v15  ;;  %v2282_v15 = vor.u32 %v2491_v13, %v2281_v11 }
 0x161   : > { %v1236_v23 = vpop.f32.mrf.mxu0  ;;  %v1387_v36 = vmax.f32 %v1385_v21, %v1386_v27 }
 0x162   : > { %v1237_v12 = vadd.f32 %v1236_v23, %v1218_v16  ;;  %v1255_v14 = vpop.f32.mrf.mxu1  ;;  %1640 = vmatpush.bf16.xpose.msra.mxu3 %v2294_v62  ;;  %v1273_v16 = vadd.f32 %v1272_v61, %v756_v29  ;;  %v2488_v23 = vld [vmem:[#allocation11 + $0x28] sm:$0xf0] }
 0x163   : > { %v1388_v39 = vrot.slane %v1387_v36, 1 }
 0x164   : > { %v1256_v26 = vadd.f32 %v1255_v14, %v1237_v12  ;;  %v1292_v24 = vadd.f32 %v1291_v5, %v1273_v16  ;;  %v2270_v14 = vor.u32 %v2488_v23, %v2269_v22 }
 0x165   : > { %v1389_v44 = vmax.f32 %v1387_v36, %v1388_v39 }
 0x166   : > { %v1325_v30 = vmax.f32 %v1256_v26, 0.0  ;;  %v1274_v17 = vpop.f32.mrf.mxu2 }
 0x167   : > { %v1419_v53 = vpack.c.bf16 %v1389_v44, %v1389_v44  ;;  %v1275_v21 = vadd.f32 %v1274_v17, %v756_v29  ;;  %v1293_v25 = vpop.f32.mrf.mxu3 }
 0x168   : > { %v1374_v31 = vsel %vm1362_vm0, %v1325_v30, 0.0 }
 0x169   : > { %v1404_v34 = vmax.f32 %v1322_v28, %v1374_v31  ;;  %v1467_v60 = vunpack.c.l.b16 %v1419_v53  ;;  %v1294_v26 = vadd.f32 %v1293_v25, %v1275_v21  ;;  %v2485_v31 = vld [vmem:[#allocation11 + $0x10] sm:$0xf0] }
 0x16a   : > { %1641 = vmatpush.bf16.xpose.msra.mxu3 %v2282_v15 }
 0x16b   : > { %v1405_v38 = vrot.slane %v1404_v34, 4 }
 0x16c   : > { %v1305_v52 = vpop.f32.mrf.mxu0 }
 0x16d   : > { %v1406_v40 = vmax.f32 %v1404_v34, %v1405_v38  ;;  %v1306_v1 = vadd.f32 %v1305_v52, %v1287_v59  ;;  %v2258_v38 = vor.u32 %v2485_v31, %v2257_v20 }
 0x16f   : > { %v1407_v41 = vrot.slane %v1406_v40, 2  ;;  %v1317_v8 = vmax.f32 %v1306_v1, 0.0 }
 0x171   : > { %v1408_v45 = vmax.f32 %v1406_v40, %v1407_v41 }
 0x172   : > { %1642 = vmatpush.bf16.xpose.msra.mxu3 %v2270_v14 }
 0x173   : > { %v1409_v49 = vrot.slane %v1408_v45, 1 }
 0x174   : > { %v1307_v2 = vpop.f32.mrf.mxu0 }
 0x175   : > { %v1410_v54 = vmax.f32 %v1408_v45, %v1409_v49  ;;  %v1308_v4 = vadd.f32 %v1307_v2, %v1289_v63 }
 0x177   : > { %v1422_v58 = vpack.c.bf16 %v1410_v54, %v1410_v54  ;;  %v1320_v6 = vmax.f32 %v1308_v4, 0.0 }
 0x179   : > { %v1470_v33 = vunpack.c.l.b16 %v1422_v58  ;;  %v1369_v9 = vsel %vm1363_vm2, %v1320_v6, 0.0 }
 0x17a   : > { %v1390_v10 = vmax.f32 %v1317_v8, %v1369_v9  ;;  %1643 = vmatpush.bf16.xpose.msra.mxu3 %v2258_v38 }
 0x17b   : > { %v1474_v0 = vsel %vm1472_vm1, %v1470_v33, %v1467_v60 }
 0x17c   : > { %v1477_v3 = vpack.c.b16 %v1474_v0, %v1474_v0  ;;  %v1310_v18 = vpop.f32.mrf.mxu0  ;;  %v1391_v19 = vrot.slane %v1390_v10, 4 }
 0x17d   : > { %v1311_v27 = vadd.f32 %v1310_v18, %v1292_v24 }
 0x17e   : > { %1631 = vmatmul.bf16.vlgmr.msra.gmra.mxu2 %v1477_v3  ;;  %v1392_v12 = vmax.f32 %v1390_v10, %v1391_v19 }
 0x17f   : > { %v1323_v36 = vmax.f32 %v1311_v27, 0.0 }
 0x180   : > { %v1393_v32 = vrot.slane %v1392_v12, 2 }
 0x182   : > { %v1394_v37 = vmax.f32 %v1392_v12, %v1393_v32 }
 0x184   : > { %v1312_v28 = vpop.f32.mrf.mxu0  ;;  %v1395_v40 = vrot.slane %v1394_v37, 1 }
 0x185   : > { %v1313_v30 = vadd.f32 %v1312_v28, %v1294_v26 }
 0x186   : > { %v1396_v42 = vmax.f32 %v1394_v37, %v1395_v40 }
 0x187   : > { %v1326_v35 = vmax.f32 %v1313_v30, 0.0 }
 0x188   : > { %v1420_v46 = vpack.c.bf16 %v1396_v42, %v1396_v42 }
 0x189   : > { %v1375_v34 = vsel %vm1363_vm2, %v1326_v35, 0.0 }
 0x18a   : > { %v1411_v7 = vmax.f32 %v1323_v36, %v1375_v34  ;;  %v1468_v49 = vunpack.c.l.b16 %v1420_v46 }
 0x18c   : > { %v1412_v39 = vrot.slane %v1411_v7, 4 }
 0x18e   : > { %v1413_v41 = vmax.f32 %v1411_v7, %v1412_v39 }
 0x190   : > { %v1414_v29 = vrot.slane %v1413_v41, 2 }
 0x192   : > { %v1415_v44 = vmax.f32 %v1413_v41, %v1414_v29 }
 0x194   : > { %v1416_v45 = vrot.slane %v1415_v44, 1 }
 0x196   : > { %v1417_v47 = vmax.f32 %v1415_v44, %v1416_v45 }
 0x198   : > { %v1423_v48 = vpack.c.bf16 %v1417_v47, %v1417_v47 }
 0x19a   : > { %v1471_v50 = vunpack.c.l.b16 %v1423_v48 }
 0x19c   : > { %v1475_v43 = vsel %vm1472_vm1, %v1471_v50, %v1468_v49 }
 0x19d   : > { %v1478_v51 = vpack.c.b16 %v1475_v43, %v1475_v43 }
 0x19f   : > { %1644 = vmatmul.bf16.vlgmr.msra.gmra.mxu3 %v1478_v51 }
 0x1dd   : > { %v1619_v52 = vpop.f32.mrf.mxu1 }
 0x1de   : > { %v1620_v57 = vadd.f32 %v2593_v56, %v1619_v52 }
 0x1e5   : > { %v1621_v53 = vpop.f32.mrf.mxu1 }
 0x201   : > { %v1632_v54 = vpop.f32.mrf.mxu2 }
 0x202   : > { %v1633_v58 = vadd.f32 %v1632_v54, %v1620_v57 }
 0x209   : > { %v1634_v55 = vpop.f32.mrf.mxu2 }
 0x222   : > { %v1645_v59 = vpop.f32.mrf.mxu3 }
 0x223   : > { %v1646_v60 = vadd.f32 %v1645_v59, %v1633_v58 }
 0x225   : > { %1649 = vst [vmem:[%s276_s18] sm:$0x3] %v1646_v60 }
 0x226   : > { %2753 = shalt.err (!%p2750_p11)
}
 0x227   : > { %2523 = dma.vmem_to_hbm [thread:$0]  (%p2890_p5), %s1664_s21, 32, %s1666_s22, %s1651_s0  }
 0x22a   : > { %v1647_v33 = vpop.f32.mrf.mxu3 }
 0x22b PF: > { %p2550_p12 = scmp.ge.s32.totalorder %s2802_s28, 2  ;;  %s1677_s16 = sand.u32 1, %s2790_s25  }
 0x22c   : > { %s1678_s19 = scalar_lea.sflag [#allocation7], %s1677_s16 }
 0x22d   : > { %p2539_p13 = pnand %p2550_p12, %p2894_p6 }
 0x22f   : > { %p2540_p0 = pneg %p2539_p13 }
 0x231   : > { %2785 = dma.done.wait (%p2540_p0), %s1678_s19, 32  }
 0x232   : > { %2787 = vsyncadd (%p2540_p0), %s1678_s19, 4294967264  ;;  %p27_p1 = scmp.ge.s32.totalorder %s2877_s30, 4   ;;  %s3341_s25 = smov %s2794_s26 }
 0x233   : > { %s3342_s26 = smov %s2798_s27  ;;  %s3343_s27 = smov %s2888_s9 }
 0x234   : > { %s3344_s28 = smov %s2877_s30  ;;  %29 = sbr.rel (!%p27_p1) target bundleno = 13 (0xd), region = 121 }
 0x239   :  { %1684 = vsyncpa [#allocation6], 1 }
 0x23a   :  { %1686 = vsyncpa [#allocation6 + $0x1], 1 }
 0x23b   :  { %1687 = vsyncpa [#allocation9], 1 }
 0x23c   :  { %1688 = vsyncpa [#allocation12], 1 }
 0x23d   :  { %1689 = vsyncpa [#allocation7], 1 }
 0x23e   :  { %1691 = vsyncpa [#allocation7 + $0x1], 1 }

</bundles_post_ra>
